<compile_context>
chip_gen: v7x
topology: tpu7x:2x2x1
jax: 0.10.0
libtpu: 0.0.40
codegen_flags: <defaults>
</compile_context>

<pallas_src>
import functools

import jax
import jax.numpy as jnp
from jax import lax
from jax.experimental import pallas as pl
from jax.experimental.pallas import tpu as pltpu

B, IN, H = 2, 16, 32          # batch, input_size, hidden_size
EPSILON = 0.5
SLAB_W = 128                  # lane-dense slab / output width (= 4*H here)


def prox_lstm_kernel(xh_ref, wbig_ref, out_ref, *,
                     hidden, in_dim, c0_off, epsilon, last):
    Hh = hidden
    In = in_dim
    N1 = In + 1

    xh = xh_ref[...]            # [B, 128] = [x | h0 | 1 | 0-pad | c0 | 0-pad]
    w_big = wbig_ref[...]       # [128, 4H] = [w_ih^T ; w_hh^T ; bias ; 0-pad] (g cols x2)

    # ---- fused LSTMCell gate matmul: bias folded via the ones lane; the c0 / pad lanes
    # ---- of xh multiply zero rows of w_big, so they do not affect the gates. ----------
    gates = jnp.dot(xh, w_big, preferred_element_type=jnp.float32)   # [B, 4H]

    # Single transcendental pass: g-gate columns were pre-scaled by 2 in the wrapper,
    # so tanh(z_g) = 2*sigmoid(2*z_g) - 1 is recovered with one select.
    lane = lax.broadcasted_iota(jnp.int32, gates.shape, 1)
    is_g = jnp.logical_and(lane >= 2 * Hh, lane < 3 * Hh)
    act = jax.nn.sigmoid(gates)
    act = jnp.where(is_g, 2.0 * act - 1.0, act)

    i_g = act[:, 0:Hh]
    f_g = act[:, Hh:2 * Hh]
    g_g = act[:, 2 * Hh:3 * Hh]
    o_g = act[:, 3 * Hh:4 * Hh]
    c0 = xh[:, c0_off:c0_off + Hh]            # [B, H]

    s = f_g * c0 + i_g * g_g                  # new cell state [B, H]
    h = o_g * jnp.tanh(s)                     # new hidden     [B, H]

    pad = jnp.zeros((xh.shape[0], out_ref.shape[1] - 2 * Hh), jnp.float32)

    if last:
        # Proximal mapping is dead work on the last-step path: skip it entirely.
        out_ref[...] = jnp.concatenate([h, s, pad], axis=1)
        return

    # ---- closed-form Jacobian, transposed layout: Gt[b,i,h] = d s[b,h] / d x[b,i] ----
    a_i = g_g * i_g * (1.0 - i_g)             # d s / d z_i
    a_f = c0 * f_g * (1.0 - f_g)              # d s / d z_f
    a_g = (0.5 * i_g) * (1.0 - g_g * g_g)     # d s / d z_g ; 0.5 undoes the x2 weight scale
    wi_t = w_big[0:In, 0:Hh]                  # [In, H]  = w_ih[0:H].T
    wf_t = w_big[0:In, Hh:2 * Hh]             # [In, H]  = w_ih[H:2H].T
    wg2_t = w_big[0:In, 2 * Hh:3 * Hh]        # [In, H]  = 2 * w_ih[2H:3H].T
    Gt = (a_i[:, None, :] * wi_t[None]
          + a_f[:, None, :] * wf_t[None]
          + a_g[:, None, :] * wg2_t[None])    # [B, In, H]

    # ---- Woodbury: c = s - eps * G @ y  with  (I + eps*G^T G) y = G^T s   (In x In) ----
    # RHS fused into the Gram matmul as an extra column: m = [G^T G | G^T s].
    gta = jnp.concatenate([Gt, s[:, None, :]], axis=1)                # [B, In+1, H]
    m = lax.dot_general(Gt, gta, (((2,), (2,)), ((0,), (0,))),
                        preferred_element_type=jnp.float32)           # [B, In, In+1]

    row_i = lax.broadcasted_iota(jnp.int32, (In, N1), 0)
    col_i = lax.broadcasted_iota(jnp.int32, (In, N1), 1)
    eye_pad = (row_i == col_i).astype(jnp.float32)                    # identity, 0 RHS col
    col_scale = jnp.where(col_i < In, jnp.float32(epsilon), jnp.float32(1.0))
    aug = m * col_scale[None] + eye_pad[None]                         # [B, In, N1] registers

    # ---- fully unrolled, pivot-free Gauss-Jordan (A SPD, all pivots >= 1) ------------
    sub_iota = lax.broadcasted_iota(jnp.int32, (1, In, 1), 1)
    for k in range(In):                        # static trip count -> straight-line code
        prow = aug[:, k:k + 1, :]              # [B, 1, N1] pivot row
        piv = prow[:, :, k:k + 1]              # [B, 1, 1]  pivot element
        inv_p = 1.0 / piv                      # exact divide (16 scalars, robust)
        prn = prow * inv_p                     # normalized pivot row
        colk = aug[:, :, k:k + 1]              # [B, In, 1] pivot column
        onehot = (sub_iota == k).astype(jnp.float32)
        aug = aug - (colk - onehot) * prn      # single rank-1 update (incl. RHS column)

    y3 = aug[:, :, In:N1]                      # [B, In, 1]  y = A^{-1} (G^T s)
    c = s - epsilon * jnp.sum(Gt * y3, axis=1)            # [B, H]

    out_ref[...] = jnp.concatenate([h, c, pad], axis=1)   # one lane-dense [B,128] store


def proximal_lstm_cell(x, w_ih, w_hh, b_ih, b_hh, epsilon, hx=None, last=False):
    """JAX wrapper mirroring ProximalLSTMCell.forward (LSTMCell inside)."""
    Bb, In = x.shape
    Hh = w_hh.shape[1]
    dt = jnp.float32
    if hx is None:
        h0 = jnp.zeros((Bb, Hh), dt)
        c0 = jnp.zeros((Bb, Hh), dt)
    else:
        h0, c0 = hx

    c0_off = ((In + Hh + 1 + 7) // 8) * 8          # start lane of c0 inside the slab
    assert c0_off + Hh <= SLAB_W and 4 * Hh <= SLAB_W and 2 * Hh <= SLAB_W

    # Fused gate weight: rows [w_ih^T ; w_hh^T ; bias ; 0-pad to 128]; the g-gate
    # columns (incl. bias) are scaled by 2 so the kernel only needs one sigmoid pass.
    lane4h = jnp.arange(4 * Hh)
    g_scale = jnp.where((lane4h >= 2 * Hh) & (lane4h < 3 * Hh), 2.0, 1.0).astype(dt)
    w_rows = jnp.concatenate([w_ih.T, w_hh.T, (b_ih + b_hh)[None, :]], axis=0)  # [In+H+1,4H]
    w_rows = w_rows * g_scale[None, :]
    w_big = jnp.zeros((SLAB_W, 4 * Hh), dt).at[0:In + Hh + 1, :].set(w_rows)    # [128, 4H]

    # Lane-dense input slab [x | h0 | 1 | 0 | c0 | 0]  ->  single input DMA per operand.
    xh = jnp.zeros((Bb, SLAB_W), dt)
    xh = xh.at[:, 0:In].set(x)
    xh = xh.at[:, In:In + Hh].set(h0)
    xh = xh.at[:, In + Hh].set(1.0)
    xh = xh.at[:, c0_off:c0_off + Hh].set(c0)

    kernel = functools.partial(prox_lstm_kernel, hidden=Hh, in_dim=In,
                               c0_off=c0_off, epsilon=float(epsilon),
                               last=bool(last))
    vmem = lambda: pl.BlockSpec(memory_space=pltpu.MemorySpace.VMEM)
    out = pl.pallas_call(
        kernel,
        out_shape=jax.ShapeDtypeStruct((Bb, SLAB_W), dt),   # packed [h | c-or-s | pad]
        in_specs=[vmem(), vmem()],
        out_specs=vmem(),
    )(xh, w_big)

    return out[:, 0:Hh], out[:, Hh:2 * Hh]


def ref_forward(x, h0, c0, w_ih, w_hh, b_ih, b_hh, eps):
    """Pure-JAX reference: LSTMCell + autodiff Jacobian + linalg.solve."""
    Hh = h0.shape[1]

    def s_fn(xb, hb, cb):
        g = w_ih @ xb + w_hh @ hb + b_ih + b_hh
        i = jax.nn.sigmoid(g[0:Hh])
        f = jax.nn.sigmoid(g[Hh:2 * Hh])
        gg = jnp.tanh(g[2 * Hh:3 * Hh])
        return f * cb + i * gg

    def h_fn(xb, hb, cb):
        g = w_ih @ xb + w_hh @ hb + b_ih + b_hh
        o = jax.nn.sigmoid(g[3 * Hh:4 * Hh])
        return o * jnp.tanh(s_fn(xb, hb, cb))

    s = jax.vmap(s_fn)(x, h0, c0)
    h = jax.vmap(h_fn)(x, h0, c0)
    G = jax.vmap(lambda xb, hb, cb: jax.jacrev(s_fn)(xb, hb, cb))(x, h0, c0)
    A = jnp.eye(Hh)[None] + eps * jnp.einsum('bij,bkj->bik', G, G)
    c = jnp.linalg.solve(A, s[..., None])[..., 0]
    return h, c, s


if __name__ == "__main__":
    key = jax.random.PRNGKey(0)
    ks = jax.random.split(key, 7)
    k_scale = 1.0 / jnp.sqrt(jnp.float32(H))   # PyTorch LSTMCell init range
    w_ih = jax.random.uniform(ks[0], (4 * H, IN), jnp.float32, -k_scale, k_scale)
    w_hh = jax.random.uniform(ks[1], (4 * H, H), jnp.float32, -k_scale, k_scale)
    b_ih = jax.random.uniform(ks[2], (4 * H,), jnp.float32, -k_scale, k_scale)
    b_hh = jax.random.uniform(ks[3], (4 * H,), jnp.float32, -k_scale, k_scale)
    x = jax.random.normal(ks[4], (B, IN), jnp.float32)
    h0 = jax.random.normal(ks[5], (B, H), jnp.float32)
    c0 = jax.random.normal(ks[6], (B, H), jnp.float32)

    fwd = jax.jit(proximal_lstm_cell, static_argnums=(5, 7))

    h_ref, c_ref, s_ref = ref_forward(x, h0, c0, w_ih, w_hh, b_ih, b_hh, EPSILON)

    # last=False path: proximal mapping applied.
    h, c = fwd(x, w_ih, w_hh, b_ih, b_hh, EPSILON, (h0, c0), False)
    jax.block_until_ready((h, c))
    assert jnp.allclose(h, h_ref, atol=1e-4, rtol=1e-4), "h mismatch"
    assert jnp.allclose(c, c_ref, atol=1e-4, rtol=1e-4), "c mismatch"

    # last=True path: solve skipped, returns (h, s).
    h2, s2 = fwd(x, w_ih, w_hh, b_ih, b_hh, EPSILON, (h0, c0), True)
    jax.block_until_ready((h2, s2))
    assert jnp.allclose(h2, h_ref, atol=1e-4, rtol=1e-4), "h (last) mismatch"
    assert jnp.allclose(s2, s_ref, atol=1e-4, rtol=1e-4), "s (last) mismatch"

    print("KERNEL_OK")
</pallas_src>

<mosaic_0001>
module attributes {stable_mosaic.version = 11 : i64} {
  func.func @prox_lstm_kernel(%arg0: memref<2x128xf32, #tpu.memory_space<vmem>>, %arg1: memref<128x128xf32, #tpu.memory_space<vmem>>, %arg2: memref<2x128xf32, #tpu.memory_space<vmem>>) attributes {dimension_semantics = [], scalar_prefetch = 0 : i64, scratch_operands = 0 : i64, tpu.core_type = #tpu.core_type<tc>} {
    %c0 = arith.constant 0 : index
    %c0_0 = arith.constant 0 : index
    %0 = vector.load %arg0[%c0, %c0_0] : memref<2x128xf32, #tpu.memory_space<vmem>>, vector<2x128xf32>
    %c0_1 = arith.constant 0 : index
    %c0_2 = arith.constant 0 : index
    %1 = vector.load %arg1[%c0_1, %c0_2] : memref<128x128xf32, #tpu.memory_space<vmem>>, vector<128x128xf32>
    %cst = arith.constant dense<0.000000e+00> : vector<2x128xf32>
    %2 = tpu.matmul %0, %1, %cst {dimension_numbers = #tpu.dot_dimension_numbers<[1], [0], [0], [1], [0, 0, 1, 1], [], []>} : vector<2x128xf32>, vector<128x128xf32>, vector<2x128xf32> -> vector<2x128xf32>
    %3 = tpu.iota {dimensions = array<i32: 1>} : vector<2x128xi32>
    %c64_i32 = arith.constant 64 : i32
    %4 = vector.broadcast %c64_i32 : i32 to vector<2x128xi32>
    %5 = arith.cmpi sge, %3, %4 : vector<2x128xi32>
    %c96_i32 = arith.constant 96 : i32
    %6 = vector.broadcast %c96_i32 : i32 to vector<2x128xi32>
    %7 = arith.cmpi slt, %3, %6 : vector<2x128xi32>
    %8 = arith.andi %5, %7 : vector<2x128xi1>
    %9 = arith.negf %2 : vector<2x128xf32>
    %10 = math.exp %9 : vector<2x128xf32>
    %cst_3 = arith.constant 1.000000e+00 : f32
    %11 = vector.broadcast %cst_3 : f32 to vector<2x128xf32>
    %12 = arith.addf %11, %10 : vector<2x128xf32>
    %13 = arith.divf %11, %12 : vector<2x128xf32>
    %cst_4 = arith.constant 2.000000e+00 : f32
    %14 = vector.broadcast %cst_4 : f32 to vector<2x128xf32>
    %15 = arith.mulf %14, %13 : vector<2x128xf32>
    %cst_5 = arith.constant 1.000000e+00 : f32
    %16 = vector.broadcast %cst_5 : f32 to vector<2x128xf32>
    %17 = arith.subf %15, %16 : vector<2x128xf32>
    %18 = arith.select %8, %17, %13 : vector<2x128xi1>, vector<2x128xf32>
    %19 = vector.extract_strided_slice %18 {offsets = [0, 0], sizes = [2, 32], strides = [1, 1]} : vector<2x128xf32> to vector<2x32xf32>
    %20 = vector.extract_strided_slice %18 {offsets = [0, 32], sizes = [2, 32], strides = [1, 1]} : vector<2x128xf32> to vector<2x32xf32>
    %21 = vector.extract_strided_slice %18 {offsets = [0, 64], sizes = [2, 32], strides = [1, 1]} : vector<2x128xf32> to vector<2x32xf32>
    %22 = vector.extract_strided_slice %18 {offsets = [0, 96], sizes = [2, 32], strides = [1, 1]} : vector<2x128xf32> to vector<2x32xf32>
    %23 = vector.extract_strided_slice %0 {offsets = [0, 56], sizes = [2, 32], strides = [1, 1]} : vector<2x128xf32> to vector<2x32xf32>
    %24 = arith.mulf %20, %23 : vector<2x32xf32>
    %25 = arith.mulf %19, %21 : vector<2x32xf32>
    %26 = arith.addf %24, %25 : vector<2x32xf32>
    %27 = math.tanh %26 : vector<2x32xf32>
    %28 = arith.mulf %22, %27 : vector<2x32xf32>
    %cst_6 = arith.constant 0.000000e+00 : f32
    %29 = vector.broadcast %cst_6 : f32 to vector<2x64xf32>
    %30 = arith.mulf %21, %19 : vector<2x32xf32>
    %cst_7 = arith.constant 1.000000e+00 : f32
    %31 = vector.broadcast %cst_7 : f32 to vector<2x32xf32>
    %32 = arith.subf %31, %19 : vector<2x32xf32>
    %33 = arith.mulf %30, %32 : vector<2x32xf32>
    %34 = arith.mulf %23, %20 : vector<2x32xf32>
    %cst_8 = arith.constant 1.000000e+00 : f32
    %35 = vector.broadcast %cst_8 : f32 to vector<2x32xf32>
    %36 = arith.subf %35, %20 : vector<2x32xf32>
    %37 = arith.mulf %34, %36 : vector<2x32xf32>
    %cst_9 = arith.constant 5.000000e-01 : f32
    %38 = vector.broadcast %cst_9 : f32 to vector<2x32xf32>
    %39 = arith.mulf %38, %19 : vector<2x32xf32>
    %40 = arith.mulf %21, %21 : vector<2x32xf32>
    %cst_10 = arith.constant 1.000000e+00 : f32
    %41 = vector.broadcast %cst_10 : f32 to vector<2x32xf32>
    %42 = arith.subf %41, %40 : vector<2x32xf32>
    %43 = arith.mulf %39, %42 : vector<2x32xf32>
    %44 = vector.extract_strided_slice %1 {offsets = [0, 0], sizes = [16, 32], strides = [1, 1]} : vector<128x128xf32> to vector<16x32xf32>
    %45 = vector.extract_strided_slice %1 {offsets = [0, 32], sizes = [16, 32], strides = [1, 1]} : vector<128x128xf32> to vector<16x32xf32>
    %46 = vector.extract_strided_slice %1 {offsets = [0, 64], sizes = [16, 32], strides = [1, 1]} : vector<128x128xf32> to vector<16x32xf32>
    %47 = vector.shape_cast %33 : vector<2x32xf32> to vector<2x1x32xf32>
    %48 = vector.shape_cast %44 : vector<16x32xf32> to vector<1x16x32xf32>
    %49 = vector.broadcast %47 : vector<2x1x32xf32> to vector<2x16x32xf32>
    %50 = vector.broadcast %48 : vector<1x16x32xf32> to vector<2x16x32xf32>
    %51 = arith.mulf %49, %50 : vector<2x16x32xf32>
    %52 = vector.shape_cast %37 : vector<2x32xf32> to vector<2x1x32xf32>
    %53 = vector.shape_cast %45 : vector<16x32xf32> to vector<1x16x32xf32>
    %54 = vector.broadcast %52 : vector<2x1x32xf32> to vector<2x16x32xf32>
    %55 = vector.broadcast %53 : vector<1x16x32xf32> to vector<2x16x32xf32>
    %56 = arith.mulf %54, %55 : vector<2x16x32xf32>
    %57 = arith.addf %51, %56 : vector<2x16x32xf32>
    %58 = vector.shape_cast %43 : vector<2x32xf32> to vector<2x1x32xf32>
    %59 = vector.shape_cast %46 : vector<16x32xf32> to vector<1x16x32xf32>
    %60 = vector.broadcast %58 : vector<2x1x32xf32> to vector<2x16x32xf32>
    %61 = vector.broadcast %59 : vector<1x16x32xf32> to vector<2x16x32xf32>
    %62 = arith.mulf %60, %61 : vector<2x16x32xf32>
    %63 = arith.addf %57, %62 : vector<2x16x32xf32>
    %64 = vector.shape_cast %26 : vector<2x32xf32> to vector<2x1x32xf32>
    %65 = tpu.concatenate %63, %64 in 1 : vector<2x16x32xf32>, vector<2x1x32xf32> -> vector<2x17x32xf32>
    %cst_11 = arith.constant dense<0.000000e+00> : vector<2x16x17xf32>
    %66 = tpu.matmul %63, %65, %cst_11 {dimension_numbers = #tpu.dot_dimension_numbers<[2], [2], [1], [1], [0, 0, 0, 1, 1, 1], [0], [0]>} : vector<2x16x32xf32>, vector<2x17x32xf32>, vector<2x16x17xf32> -> vector<2x16x17xf32>
    %67 = tpu.iota {dimensions = array<i32: 0>} : vector<16x17xi32>
    %68 = tpu.iota {dimensions = array<i32: 1>} : vector<16x17xi32>
    %69 = arith.cmpi eq, %67, %68 : vector<16x17xi32>
    %70 = arith.extui %69 : vector<16x17xi1> to vector<16x17xi32>
    %71 = arith.sitofp %70 : vector<16x17xi32> to vector<16x17xf32>
    %c16_i32 = arith.constant 16 : i32
    %72 = vector.broadcast %c16_i32 : i32 to vector<16x17xi32>
    %73 = arith.cmpi slt, %68, %72 : vector<16x17xi32>
    %cst_12 = arith.constant 5.000000e-01 : f32
    %cst_13 = arith.constant 1.000000e+00 : f32
    %74 = vector.broadcast %cst_12 : f32 to vector<16x17xf32>
    %75 = vector.broadcast %cst_13 : f32 to vector<16x17xf32>
    %76 = arith.select %73, %74, %75 : vector<16x17xi1>, vector<16x17xf32>
    %77 = vector.shape_cast %76 : vector<16x17xf32> to vector<1x16x17xf32>
    %78 = vector.broadcast %77 : vector<1x16x17xf32> to vector<2x16x17xf32>
    %79 = arith.mulf %66, %78 : vector<2x16x17xf32>
    %80 = vector.shape_cast %71 : vector<16x17xf32> to vector<1x16x17xf32>
    %81 = vector.broadcast %80 : vector<1x16x17xf32> to vector<2x16x17xf32>
    %82 = arith.addf %79, %81 : vector<2x16x17xf32>
    %83 = tpu.iota {dimensions = array<i32: 1>} : vector<1x16x1xi32>
    %84 = vector.extract_strided_slice %82 {offsets = [0, 0, 0], sizes = [2, 1, 17], strides = [1, 1, 1]} : vector<2x16x17xf32> to vector<2x1x17xf32>
    %85 = vector.extract_strided_slice %84 {offsets = [0, 0, 0], sizes = [2, 1, 1], strides = [1, 1, 1]} : vector<2x1x17xf32> to vector<2x1x1xf32>
    %cst_14 = arith.constant 1.000000e+00 : f32
    %86 = vector.broadcast %cst_14 : f32 to vector<2x1x1xf32>
    %87 = arith.divf %86, %85 : vector<2x1x1xf32>
    %88 = vector.broadcast %87 : vector<2x1x1xf32> to vector<2x1x17xf32>
    %89 = arith.mulf %84, %88 : vector<2x1x17xf32>
    %90 = vector.extract_strided_slice %82 {offsets = [0, 0, 0], sizes = [2, 16, 1], strides = [1, 1, 1]} : vector<2x16x17xf32> to vector<2x16x1xf32>
    %c0_i32 = arith.constant 0 : i32
    %91 = vector.broadcast %c0_i32 : i32 to vector<1x16x1xi32>
    %92 = arith.cmpi eq, %83, %91 : vector<1x16x1xi32>
    %93 = arith.extui %92 : vector<1x16x1xi1> to vector<1x16x1xi32>
    %94 = arith.sitofp %93 : vector<1x16x1xi32> to vector<1x16x1xf32>
    %95 = vector.broadcast %94 : vector<1x16x1xf32> to vector<2x16x1xf32>
    %96 = arith.subf %90, %95 : vector<2x16x1xf32>
    %97 = vector.broadcast %96 : vector<2x16x1xf32> to vector<2x16x17xf32>
    %98 = vector.broadcast %89 : vector<2x1x17xf32> to vector<2x16x17xf32>
    %99 = arith.mulf %97, %98 : vector<2x16x17xf32>
    %100 = arith.subf %82, %99 : vector<2x16x17xf32>
    %101 = vector.extract_strided_slice %100 {offsets = [0, 1, 0], sizes = [2, 1, 17], strides = [1, 1, 1]} : vector<2x16x17xf32> to vector<2x1x17xf32>
    %102 = vector.extract_strided_slice %101 {offsets = [0, 0, 1], sizes = [2, 1, 1], strides = [1, 1, 1]} : vector<2x1x17xf32> to vector<2x1x1xf32>
    %cst_15 = arith.constant 1.000000e+00 : f32
    %103 = vector.broadcast %cst_15 : f32 to vector<2x1x1xf32>
    %104 = arith.divf %103, %102 : vector<2x1x1xf32>
    %105 = vector.broadcast %104 : vector<2x1x1xf32> to vector<2x1x17xf32>
    %106 = arith.mulf %101, %105 : vector<2x1x17xf32>
    %107 = vector.extract_strided_slice %100 {offsets = [0, 0, 1], sizes = [2, 16, 1], strides = [1, 1, 1]} : vector<2x16x17xf32> to vector<2x16x1xf32>
    %c1_i32 = arith.constant 1 : i32
    %108 = vector.broadcast %c1_i32 : i32 to vector<1x16x1xi32>
    %109 = arith.cmpi eq, %83, %108 : vector<1x16x1xi32>
    %110 = arith.extui %109 : vector<1x16x1xi1> to vector<1x16x1xi32>
    %111 = arith.sitofp %110 : vector<1x16x1xi32> to vector<1x16x1xf32>
    %112 = vector.broadcast %111 : vector<1x16x1xf32> to vector<2x16x1xf32>
    %113 = arith.subf %107, %112 : vector<2x16x1xf32>
    %114 = vector.broadcast %113 : vector<2x16x1xf32> to vector<2x16x17xf32>
    %115 = vector.broadcast %106 : vector<2x1x17xf32> to vector<2x16x17xf32>
    %116 = arith.mulf %114, %115 : vector<2x16x17xf32>
    %117 = arith.subf %100, %116 : vector<2x16x17xf32>
    %118 = vector.extract_strided_slice %117 {offsets = [0, 2, 0], sizes = [2, 1, 17], strides = [1, 1, 1]} : vector<2x16x17xf32> to vector<2x1x17xf32>
    %119 = vector.extract_strided_slice %118 {offsets = [0, 0, 2], sizes = [2, 1, 1], strides = [1, 1, 1]} : vector<2x1x17xf32> to vector<2x1x1xf32>
    %cst_16 = arith.constant 1.000000e+00 : f32
    %120 = vector.broadcast %cst_16 : f32 to vector<2x1x1xf32>
    %121 = arith.divf %120, %119 : vector<2x1x1xf32>
    %122 = vector.broadcast %121 : vector<2x1x1xf32> to vector<2x1x17xf32>
    %123 = arith.mulf %118, %122 : vector<2x1x17xf32>
    %124 = vector.extract_strided_slice %117 {offsets = [0, 0, 2], sizes = [2, 16, 1], strides = [1, 1, 1]} : vector<2x16x17xf32> to vector<2x16x1xf32>
    %c2_i32 = arith.constant 2 : i32
    %125 = vector.broadcast %c2_i32 : i32 to vector<1x16x1xi32>
    %126 = arith.cmpi eq, %83, %125 : vector<1x16x1xi32>
    %127 = arith.extui %126 : vector<1x16x1xi1> to vector<1x16x1xi32>
    %128 = arith.sitofp %127 : vector<1x16x1xi32> to vector<1x16x1xf32>
    %129 = vector.broadcast %128 : vector<1x16x1xf32> to vector<2x16x1xf32>
    %130 = arith.subf %124, %129 : vector<2x16x1xf32>
    %131 = vector.broadcast %130 : vector<2x16x1xf32> to vector<2x16x17xf32>
    %132 = vector.broadcast %123 : vector<2x1x17xf32> to vector<2x16x17xf32>
    %133 = arith.mulf %131, %132 : vector<2x16x17xf32>
    %134 = arith.subf %117, %133 : vector<2x16x17xf32>
    %135 = vector.extract_strided_slice %134 {offsets = [0, 3, 0], sizes = [2, 1, 17], strides = [1, 1, 1]} : vector<2x16x17xf32> to vector<2x1x17xf32>
    %136 = vector.extract_strided_slice %135 {offsets = [0, 0, 3], sizes = [2, 1, 1], strides = [1, 1, 1]} : vector<2x1x17xf32> to vector<2x1x1xf32>
    %cst_17 = arith.constant 1.000000e+00 : f32
    %137 = vector.broadcast %cst_17 : f32 to vector<2x1x1xf32>
    %138 = arith.divf %137, %136 : vector<2x1x1xf32>
    %139 = vector.broadcast %138 : vector<2x1x1xf32> to vector<2x1x17xf32>
    %140 = arith.mulf %135, %139 : vector<2x1x17xf32>
    %141 = vector.extract_strided_slice %134 {offsets = [0, 0, 3], sizes = [2, 16, 1], strides = [1, 1, 1]} : vector<2x16x17xf32> to vector<2x16x1xf32>
    %c3_i32 = arith.constant 3 : i32
    %142 = vector.broadcast %c3_i32 : i32 to vector<1x16x1xi32>
    %143 = arith.cmpi eq, %83, %142 : vector<1x16x1xi32>
    %144 = arith.extui %143 : vector<1x16x1xi1> to vector<1x16x1xi32>
    %145 = arith.sitofp %144 : vector<1x16x1xi32> to vector<1x16x1xf32>
    %146 = vector.broadcast %145 : vector<1x16x1xf32> to vector<2x16x1xf32>
    %147 = arith.subf %141, %146 : vector<2x16x1xf32>
    %148 = vector.broadcast %147 : vector<2x16x1xf32> to vector<2x16x17xf32>
    %149 = vector.broadcast %140 : vector<2x1x17xf32> to vector<2x16x17xf32>
    %150 = arith.mulf %148, %149 : vector<2x16x17xf32>
    %151 = arith.subf %134, %150 : vector<2x16x17xf32>
    %152 = vector.extract_strided_slice %151 {offsets = [0, 4, 0], sizes = [2, 1, 17], strides = [1, 1, 1]} : vector<2x16x17xf32> to vector<2x1x17xf32>
    %153 = vector.extract_strided_slice %152 {offsets = [0, 0, 4], sizes = [2, 1, 1], strides = [1, 1, 1]} : vector<2x1x17xf32> to vector<2x1x1xf32>
    %cst_18 = arith.constant 1.000000e+00 : f32
    %154 = vector.broadcast %cst_18 : f32 to vector<2x1x1xf32>
    %155 = arith.divf %154, %153 : vector<2x1x1xf32>
    %156 = vector.broadcast %155 : vector<2x1x1xf32> to vector<2x1x17xf32>
    %157 = arith.mulf %152, %156 : vector<2x1x17xf32>
    %158 = vector.extract_strided_slice %151 {offsets = [0, 0, 4], sizes = [2, 16, 1], strides = [1, 1, 1]} : vector<2x16x17xf32> to vector<2x16x1xf32>
    %c4_i32 = arith.constant 4 : i32
    %159 = vector.broadcast %c4_i32 : i32 to vector<1x16x1xi32>
    %160 = arith.cmpi eq, %83, %159 : vector<1x16x1xi32>
    %161 = arith.extui %160 : vector<1x16x1xi1> to vector<1x16x1xi32>
    %162 = arith.sitofp %161 : vector<1x16x1xi32> to vector<1x16x1xf32>
    %163 = vector.broadcast %162 : vector<1x16x1xf32> to vector<2x16x1xf32>
    %164 = arith.subf %158, %163 : vector<2x16x1xf32>
    %165 = vector.broadcast %164 : vector<2x16x1xf32> to vector<2x16x17xf32>
    %166 = vector.broadcast %157 : vector<2x1x17xf32> to vector<2x16x17xf32>
    %167 = arith.mulf %165, %166 : vector<2x16x17xf32>
    %168 = arith.subf %151, %167 : vector<2x16x17xf32>
    %169 = vector.extract_strided_slice %168 {offsets = [0, 5, 0], sizes = [2, 1, 17], strides = [1, 1, 1]} : vector<2x16x17xf32> to vector<2x1x17xf32>
    %170 = vector.extract_strided_slice %169 {offsets = [0, 0, 5], sizes = [2, 1, 1], strides = [1, 1, 1]} : vector<2x1x17xf32> to vector<2x1x1xf32>
    %cst_19 = arith.constant 1.000000e+00 : f32
    %171 = vector.broadcast %cst_19 : f32 to vector<2x1x1xf32>
    %172 = arith.divf %171, %170 : vector<2x1x1xf32>
    %173 = vector.broadcast %172 : vector<2x1x1xf32> to vector<2x1x17xf32>
    %174 = arith.mulf %169, %173 : vector<2x1x17xf32>
    %175 = vector.extract_strided_slice %168 {offsets = [0, 0, 5], sizes = [2, 16, 1], strides = [1, 1, 1]} : vector<2x16x17xf32> to vector<2x16x1xf32>
    %c5_i32 = arith.constant 5 : i32
    %176 = vector.broadcast %c5_i32 : i32 to vector<1x16x1xi32>
    %177 = arith.cmpi eq, %83, %176 : vector<1x16x1xi32>
    %178 = arith.extui %177 : vector<1x16x1xi1> to vector<1x16x1xi32>
    %179 = arith.sitofp %178 : vector<1x16x1xi32> to vector<1x16x1xf32>
    %180 = vector.broadcast %179 : vector<1x16x1xf32> to vector<2x16x1xf32>
    %181 = arith.subf %175, %180 : vector<2x16x1xf32>
    %182 = vector.broadcast %181 : vector<2x16x1xf32> to vector<2x16x17xf32>
    %183 = vector.broadcast %174 : vector<2x1x17xf32> to vector<2x16x17xf32>
    %184 = arith.mulf %182, %183 : vector<2x16x17xf32>
    %185 = arith.subf %168, %184 : vector<2x16x17xf32>
    %186 = vector.extract_strided_slice %185 {offsets = [0, 6, 0], sizes = [2, 1, 17], strides = [1, 1, 1]} : vector<2x16x17xf32> to vector<2x1x17xf32>
    %187 = vector.extract_strided_slice %186 {offsets = [0, 0, 6], sizes = [2, 1, 1], strides = [1, 1, 1]} : vector<2x1x17xf32> to vector<2x1x1xf32>
    %cst_20 = arith.constant 1.000000e+00 : f32
    %188 = vector.broadcast %cst_20 : f32 to vector<2x1x1xf32>
    %189 = arith.divf %188, %187 : vector<2x1x1xf32>
    %190 = vector.broadcast %189 : vector<2x1x1xf32> to vector<2x1x17xf32>
    %191 = arith.mulf %186, %190 : vector<2x1x17xf32>
    %192 = vector.extract_strided_slice %185 {offsets = [0, 0, 6], sizes = [2, 16, 1], strides = [1, 1, 1]} : vector<2x16x17xf32> to vector<2x16x1xf32>
    %c6_i32 = arith.constant 6 : i32
    %193 = vector.broadcast %c6_i32 : i32 to vector<1x16x1xi32>
    %194 = arith.cmpi eq, %83, %193 : vector<1x16x1xi32>
    %195 = arith.extui %194 : vector<1x16x1xi1> to vector<1x16x1xi32>
    %196 = arith.sitofp %195 : vector<1x16x1xi32> to vector<1x16x1xf32>
    %197 = vector.broadcast %196 : vector<1x16x1xf32> to vector<2x16x1xf32>
    %198 = arith.subf %192, %197 : vector<2x16x1xf32>
    %199 = vector.broadcast %198 : vector<2x16x1xf32> to vector<2x16x17xf32>
    %200 = vector.broadcast %191 : vector<2x1x17xf32> to vector<2x16x17xf32>
    %201 = arith.mulf %199, %200 : vector<2x16x17xf32>
    %202 = arith.subf %185, %201 : vector<2x16x17xf32>
    %203 = vector.extract_strided_slice %202 {offsets = [0, 7, 0], sizes = [2, 1, 17], strides = [1, 1, 1]} : vector<2x16x17xf32> to vector<2x1x17xf32>
    %204 = vector.extract_strided_slice %203 {offsets = [0, 0, 7], sizes = [2, 1, 1], strides = [1, 1, 1]} : vector<2x1x17xf32> to vector<2x1x1xf32>
    %cst_21 = arith.constant 1.000000e+00 : f32
    %205 = vector.broadcast %cst_21 : f32 to vector<2x1x1xf32>
    %206 = arith.divf %205, %204 : vector<2x1x1xf32>
    %207 = vector.broadcast %206 : vector<2x1x1xf32> to vector<2x1x17xf32>
    %208 = arith.mulf %203, %207 : vector<2x1x17xf32>
    %209 = vector.extract_strided_slice %202 {offsets = [0, 0, 7], sizes = [2, 16, 1], strides = [1, 1, 1]} : vector<2x16x17xf32> to vector<2x16x1xf32>
    %c7_i32 = arith.constant 7 : i32
    %210 = vector.broadcast %c7_i32 : i32 to vector<1x16x1xi32>
    %211 = arith.cmpi eq, %83, %210 : vector<1x16x1xi32>
    %212 = arith.extui %211 : vector<1x16x1xi1> to vector<1x16x1xi32>
    %213 = arith.sitofp %212 : vector<1x16x1xi32> to vector<1x16x1xf32>
    %214 = vector.broadcast %213 : vector<1x16x1xf32> to vector<2x16x1xf32>
    %215 = arith.subf %209, %214 : vector<2x16x1xf32>
    %216 = vector.broadcast %215 : vector<2x16x1xf32> to vector<2x16x17xf32>
    %217 = vector.broadcast %208 : vector<2x1x17xf32> to vector<2x16x17xf32>
    %218 = arith.mulf %216, %217 : vector<2x16x17xf32>
    %219 = arith.subf %202, %218 : vector<2x16x17xf32>
    %220 = vector.extract_strided_slice %219 {offsets = [0, 8, 0], sizes = [2, 1, 17], strides = [1, 1, 1]} : vector<2x16x17xf32> to vector<2x1x17xf32>
    %221 = vector.extract_strided_slice %220 {offsets = [0, 0, 8], sizes = [2, 1, 1], strides = [1, 1, 1]} : vector<2x1x17xf32> to vector<2x1x1xf32>
    %cst_22 = arith.constant 1.000000e+00 : f32
    %222 = vector.broadcast %cst_22 : f32 to vector<2x1x1xf32>
    %223 = arith.divf %222, %221 : vector<2x1x1xf32>
    %224 = vector.broadcast %223 : vector<2x1x1xf32> to vector<2x1x17xf32>
    %225 = arith.mulf %220, %224 : vector<2x1x17xf32>
    %226 = vector.extract_strided_slice %219 {offsets = [0, 0, 8], sizes = [2, 16, 1], strides = [1, 1, 1]} : vector<2x16x17xf32> to vector<2x16x1xf32>
    %c8_i32 = arith.constant 8 : i32
    %227 = vector.broadcast %c8_i32 : i32 to vector<1x16x1xi32>
    %228 = arith.cmpi eq, %83, %227 : vector<1x16x1xi32>
    %229 = arith.extui %228 : vector<1x16x1xi1> to vector<1x16x1xi32>
    %230 = arith.sitofp %229 : vector<1x16x1xi32> to vector<1x16x1xf32>
    %231 = vector.broadcast %230 : vector<1x16x1xf32> to vector<2x16x1xf32>
    %232 = arith.subf %226, %231 : vector<2x16x1xf32>
    %233 = vector.broadcast %232 : vector<2x16x1xf32> to vector<2x16x17xf32>
    %234 = vector.broadcast %225 : vector<2x1x17xf32> to vector<2x16x17xf32>
    %235 = arith.mulf %233, %234 : vector<2x16x17xf32>
    %236 = arith.subf %219, %235 : vector<2x16x17xf32>
    %237 = vector.extract_strided_slice %236 {offsets = [0, 9, 0], sizes = [2, 1, 17], strides = [1, 1, 1]} : vector<2x16x17xf32> to vector<2x1x17xf32>
    %238 = vector.extract_strided_slice %237 {offsets = [0, 0, 9], sizes = [2, 1, 1], strides = [1, 1, 1]} : vector<2x1x17xf32> to vector<2x1x1xf32>
    %cst_23 = arith.constant 1.000000e+00 : f32
    %239 = vector.broadcast %cst_23 : f32 to vector<2x1x1xf32>
    %240 = arith.divf %239, %238 : vector<2x1x1xf32>
    %241 = vector.broadcast %240 : vector<2x1x1xf32> to vector<2x1x17xf32>
    %242 = arith.mulf %237, %241 : vector<2x1x17xf32>
    %243 = vector.extract_strided_slice %236 {offsets = [0, 0, 9], sizes = [2, 16, 1], strides = [1, 1, 1]} : vector<2x16x17xf32> to vector<2x16x1xf32>
    %c9_i32 = arith.constant 9 : i32
    %244 = vector.broadcast %c9_i32 : i32 to vector<1x16x1xi32>
    %245 = arith.cmpi eq, %83, %244 : vector<1x16x1xi32>
    %246 = arith.extui %245 : vector<1x16x1xi1> to vector<1x16x1xi32>
    %247 = arith.sitofp %246 : vector<1x16x1xi32> to vector<1x16x1xf32>
    %248 = vector.broadcast %247 : vector<1x16x1xf32> to vector<2x16x1xf32>
    %249 = arith.subf %243, %248 : vector<2x16x1xf32>
    %250 = vector.broadcast %249 : vector<2x16x1xf32> to vector<2x16x17xf32>
    %251 = vector.broadcast %242 : vector<2x1x17xf32> to vector<2x16x17xf32>
    %252 = arith.mulf %250, %251 : vector<2x16x17xf32>
    %253 = arith.subf %236, %252 : vector<2x16x17xf32>
    %254 = vector.extract_strided_slice %253 {offsets = [0, 10, 0], sizes = [2, 1, 17], strides = [1, 1, 1]} : vector<2x16x17xf32> to vector<2x1x17xf32>
    %255 = vector.extract_strided_slice %254 {offsets = [0, 0, 10], sizes = [2, 1, 1], strides = [1, 1, 1]} : vector<2x1x17xf32> to vector<2x1x1xf32>
    %cst_24 = arith.constant 1.000000e+00 : f32
    %256 = vector.broadcast %cst_24 : f32 to vector<2x1x1xf32>
    %257 = arith.divf %256, %255 : vector<2x1x1xf32>
    %258 = vector.broadcast %257 : vector<2x1x1xf32> to vector<2x1x17xf32>
    %259 = arith.mulf %254, %258 : vector<2x1x17xf32>
    %260 = vector.extract_strided_slice %253 {offsets = [0, 0, 10], sizes = [2, 16, 1], strides = [1, 1, 1]} : vector<2x16x17xf32> to vector<2x16x1xf32>
    %c10_i32 = arith.constant 10 : i32
    %261 = vector.broadcast %c10_i32 : i32 to vector<1x16x1xi32>
    %262 = arith.cmpi eq, %83, %261 : vector<1x16x1xi32>
    %263 = arith.extui %262 : vector<1x16x1xi1> to vector<1x16x1xi32>
    %264 = arith.sitofp %263 : vector<1x16x1xi32> to vector<1x16x1xf32>
    %265 = vector.broadcast %264 : vector<1x16x1xf32> to vector<2x16x1xf32>
    %266 = arith.subf %260, %265 : vector<2x16x1xf32>
    %267 = vector.broadcast %266 : vector<2x16x1xf32> to vector<2x16x17xf32>
    %268 = vector.broadcast %259 : vector<2x1x17xf32> to vector<2x16x17xf32>
    %269 = arith.mulf %267, %268 : vector<2x16x17xf32>
    %270 = arith.subf %253, %269 : vector<2x16x17xf32>
    %271 = vector.extract_strided_slice %270 {offsets = [0, 11, 0], sizes = [2, 1, 17], strides = [1, 1, 1]} : vector<2x16x17xf32> to vector<2x1x17xf32>
    %272 = vector.extract_strided_slice %271 {offsets = [0, 0, 11], sizes = [2, 1, 1], strides = [1, 1, 1]} : vector<2x1x17xf32> to vector<2x1x1xf32>
    %cst_25 = arith.constant 1.000000e+00 : f32
    %273 = vector.broadcast %cst_25 : f32 to vector<2x1x1xf32>
    %274 = arith.divf %273, %272 : vector<2x1x1xf32>
    %275 = vector.broadcast %274 : vector<2x1x1xf32> to vector<2x1x17xf32>
    %276 = arith.mulf %271, %275 : vector<2x1x17xf32>
    %277 = vector.extract_strided_slice %270 {offsets = [0, 0, 11], sizes = [2, 16, 1], strides = [1, 1, 1]} : vector<2x16x17xf32> to vector<2x16x1xf32>
    %c11_i32 = arith.constant 11 : i32
    %278 = vector.broadcast %c11_i32 : i32 to vector<1x16x1xi32>
    %279 = arith.cmpi eq, %83, %278 : vector<1x16x1xi32>
    %280 = arith.extui %279 : vector<1x16x1xi1> to vector<1x16x1xi32>
    %281 = arith.sitofp %280 : vector<1x16x1xi32> to vector<1x16x1xf32>
    %282 = vector.broadcast %281 : vector<1x16x1xf32> to vector<2x16x1xf32>
    %283 = arith.subf %277, %282 : vector<2x16x1xf32>
    %284 = vector.broadcast %283 : vector<2x16x1xf32> to vector<2x16x17xf32>
    %285 = vector.broadcast %276 : vector<2x1x17xf32> to vector<2x16x17xf32>
    %286 = arith.mulf %284, %285 : vector<2x16x17xf32>
    %287 = arith.subf %270, %286 : vector<2x16x17xf32>
    %288 = vector.extract_strided_slice %287 {offsets = [0, 12, 0], sizes = [2, 1, 17], strides = [1, 1, 1]} : vector<2x16x17xf32> to vector<2x1x17xf32>
    %289 = vector.extract_strided_slice %288 {offsets = [0, 0, 12], sizes = [2, 1, 1], strides = [1, 1, 1]} : vector<2x1x17xf32> to vector<2x1x1xf32>
    %cst_26 = arith.constant 1.000000e+00 : f32
    %290 = vector.broadcast %cst_26 : f32 to vector<2x1x1xf32>
    %291 = arith.divf %290, %289 : vector<2x1x1xf32>
    %292 = vector.broadcast %291 : vector<2x1x1xf32> to vector<2x1x17xf32>
    %293 = arith.mulf %288, %292 : vector<2x1x17xf32>
    %294 = vector.extract_strided_slice %287 {offsets = [0, 0, 12], sizes = [2, 16, 1], strides = [1, 1, 1]} : vector<2x16x17xf32> to vector<2x16x1xf32>
    %c12_i32 = arith.constant 12 : i32
    %295 = vector.broadcast %c12_i32 : i32 to vector<1x16x1xi32>
    %296 = arith.cmpi eq, %83, %295 : vector<1x16x1xi32>
    %297 = arith.extui %296 : vector<1x16x1xi1> to vector<1x16x1xi32>
    %298 = arith.sitofp %297 : vector<1x16x1xi32> to vector<1x16x1xf32>
    %299 = vector.broadcast %298 : vector<1x16x1xf32> to vector<2x16x1xf32>
    %300 = arith.subf %294, %299 : vector<2x16x1xf32>
    %301 = vector.broadcast %300 : vector<2x16x1xf32> to vector<2x16x17xf32>
    %302 = vector.broadcast %293 : vector<2x1x17xf32> to vector<2x16x17xf32>
    %303 = arith.mulf %301, %302 : vector<2x16x17xf32>
    %304 = arith.subf %287, %303 : vector<2x16x17xf32>
    %305 = vector.extract_strided_slice %304 {offsets = [0, 13, 0], sizes = [2, 1, 17], strides = [1, 1, 1]} : vector<2x16x17xf32> to vector<2x1x17xf32>
    %306 = vector.extract_strided_slice %305 {offsets = [0, 0, 13], sizes = [2, 1, 1], strides = [1, 1, 1]} : vector<2x1x17xf32> to vector<2x1x1xf32>
    %cst_27 = arith.constant 1.000000e+00 : f32
    %307 = vector.broadcast %cst_27 : f32 to vector<2x1x1xf32>
    %308 = arith.divf %307, %306 : vector<2x1x1xf32>
    %309 = vector.broadcast %308 : vector<2x1x1xf32> to vector<2x1x17xf32>
    %310 = arith.mulf %305, %309 : vector<2x1x17xf32>
    %311 = vector.extract_strided_slice %304 {offsets = [0, 0, 13], sizes = [2, 16, 1], strides = [1, 1, 1]} : vector<2x16x17xf32> to vector<2x16x1xf32>
    %c13_i32 = arith.constant 13 : i32
    %312 = vector.broadcast %c13_i32 : i32 to vector<1x16x1xi32>
    %313 = arith.cmpi eq, %83, %312 : vector<1x16x1xi32>
    %314 = arith.extui %313 : vector<1x16x1xi1> to vector<1x16x1xi32>
    %315 = arith.sitofp %314 : vector<1x16x1xi32> to vector<1x16x1xf32>
    %316 = vector.broadcast %315 : vector<1x16x1xf32> to vector<2x16x1xf32>
    %317 = arith.subf %311, %316 : vector<2x16x1xf32>
    %318 = vector.broadcast %317 : vector<2x16x1xf32> to vector<2x16x17xf32>
    %319 = vector.broadcast %310 : vector<2x1x17xf32> to vector<2x16x17xf32>
    %320 = arith.mulf %318, %319 : vector<2x16x17xf32>
    %321 = arith.subf %304, %320 : vector<2x16x17xf32>
    %322 = vector.extract_strided_slice %321 {offsets = [0, 14, 0], sizes = [2, 1, 17], strides = [1, 1, 1]} : vector<2x16x17xf32> to vector<2x1x17xf32>
    %323 = vector.extract_strided_slice %322 {offsets = [0, 0, 14], sizes = [2, 1, 1], strides = [1, 1, 1]} : vector<2x1x17xf32> to vector<2x1x1xf32>
    %cst_28 = arith.constant 1.000000e+00 : f32
    %324 = vector.broadcast %cst_28 : f32 to vector<2x1x1xf32>
    %325 = arith.divf %324, %323 : vector<2x1x1xf32>
    %326 = vector.broadcast %325 : vector<2x1x1xf32> to vector<2x1x17xf32>
    %327 = arith.mulf %322, %326 : vector<2x1x17xf32>
    %328 = vector.extract_strided_slice %321 {offsets = [0, 0, 14], sizes = [2, 16, 1], strides = [1, 1, 1]} : vector<2x16x17xf32> to vector<2x16x1xf32>
    %c14_i32 = arith.constant 14 : i32
    %329 = vector.broadcast %c14_i32 : i32 to vector<1x16x1xi32>
    %330 = arith.cmpi eq, %83, %329 : vector<1x16x1xi32>
    %331 = arith.extui %330 : vector<1x16x1xi1> to vector<1x16x1xi32>
    %332 = arith.sitofp %331 : vector<1x16x1xi32> to vector<1x16x1xf32>
    %333 = vector.broadcast %332 : vector<1x16x1xf32> to vector<2x16x1xf32>
    %334 = arith.subf %328, %333 : vector<2x16x1xf32>
    %335 = vector.broadcast %334 : vector<2x16x1xf32> to vector<2x16x17xf32>
    %336 = vector.broadcast %327 : vector<2x1x17xf32> to vector<2x16x17xf32>
    %337 = arith.mulf %335, %336 : vector<2x16x17xf32>
    %338 = arith.subf %321, %337 : vector<2x16x17xf32>
    %339 = vector.extract_strided_slice %338 {offsets = [0, 15, 0], sizes = [2, 1, 17], strides = [1, 1, 1]} : vector<2x16x17xf32> to vector<2x1x17xf32>
    %340 = vector.extract_strided_slice %339 {offsets = [0, 0, 15], sizes = [2, 1, 1], strides = [1, 1, 1]} : vector<2x1x17xf32> to vector<2x1x1xf32>
    %cst_29 = arith.constant 1.000000e+00 : f32
    %341 = vector.broadcast %cst_29 : f32 to vector<2x1x1xf32>
    %342 = arith.divf %341, %340 : vector<2x1x1xf32>
    %343 = vector.broadcast %342 : vector<2x1x1xf32> to vector<2x1x17xf32>
    %344 = arith.mulf %339, %343 : vector<2x1x17xf32>
    %345 = vector.extract_strided_slice %338 {offsets = [0, 0, 15], sizes = [2, 16, 1], strides = [1, 1, 1]} : vector<2x16x17xf32> to vector<2x16x1xf32>
    %c15_i32 = arith.constant 15 : i32
    %346 = vector.broadcast %c15_i32 : i32 to vector<1x16x1xi32>
    %347 = arith.cmpi eq, %83, %346 : vector<1x16x1xi32>
    %348 = arith.extui %347 : vector<1x16x1xi1> to vector<1x16x1xi32>
    %349 = arith.sitofp %348 : vector<1x16x1xi32> to vector<1x16x1xf32>
    %350 = vector.broadcast %349 : vector<1x16x1xf32> to vector<2x16x1xf32>
    %351 = arith.subf %345, %350 : vector<2x16x1xf32>
    %352 = vector.broadcast %351 : vector<2x16x1xf32> to vector<2x16x17xf32>
    %353 = vector.broadcast %344 : vector<2x1x17xf32> to vector<2x16x17xf32>
    %354 = arith.mulf %352, %353 : vector<2x16x17xf32>
    %355 = arith.subf %338, %354 : vector<2x16x17xf32>
    %356 = vector.extract_strided_slice %355 {offsets = [0, 0, 16], sizes = [2, 16, 1], strides = [1, 1, 1]} : vector<2x16x17xf32> to vector<2x16x1xf32>
    %357 = vector.broadcast %356 : vector<2x16x1xf32> to vector<2x16x32xf32>
    %358 = arith.mulf %63, %357 : vector<2x16x32xf32>
    %cst_30 = arith.constant dense<0.000000e+00> : vector<2x32xf32>
    %359 = vector.multi_reduction <add>, %358, %cst_30 [1] : vector<2x16x32xf32> to vector<2x32xf32>
    %cst_31 = arith.constant 5.000000e-01 : f32
    %360 = vector.broadcast %cst_31 : f32 to vector<2x32xf32>
    %361 = arith.mulf %360, %359 : vector<2x32xf32>
    %362 = arith.subf %26, %361 : vector<2x32xf32>
    %363 = tpu.concatenate %28, %362, %29 in 1 : vector<2x32xf32>, vector<2x32xf32>, vector<2x64xf32> -> vector<2x128xf32>
    %c0_32 = arith.constant 0 : index
    %c0_33 = arith.constant 0 : index
    %364 = vector.load %arg2[%c0_32, %c0_33] : memref<2x128xf32, #tpu.memory_space<vmem>>, vector<2x128xf32>
    tpu.vector_store %arg2[%c0_32, %c0_33], %363 {strides = array<i32>} : memref<2x128xf32, #tpu.memory_space<vmem>>, vector<2x128xf32>,
    return
  }
}

</mosaic_0001>

<bundles_post_ra>
// kernel: proximal_lstm_cell.1
= control target key start
LH: loop header
LB: loop body
LE: loop exit
PB: predicated region body
PF: predicated region fallthrough
CT: control target
= control target key end

     0   :  { %v1854_v0 = vmov 0.0|0.0   ;;  %vm1855_vm0 = vmmov 0   ;;  %v1856_v4 = vmov 0.0   ;;  %v98_v32 = vlaneseq  ;;  %s1860_s15 = smov 32   ;;  %s1861_s16 = smov 96   ;;  %s2181_s1 = inlined_call_operand.vmem [shape: f32[128,128], index: 1, kind: input, shape index: {}]   ;;  %s2182_s0 = inlined_call_operand.vmem [shape: f32[2,128], index: 0, kind: input, shape index: {}]   ;;  %s2183_s2 = inlined_call_operand.vmem [shape: f32[2,128], index: 2, kind: output, shape index: {}]  }
   0x1   :  { %1674 = vmatprep.subr.bf16.mxu0 %v1854_v0  ;;  %v1898_v1 = vld [vmem:[%s2181_s1] sm:$0xff]  ;;  %v1903_v2 = vld [vmem:[%s2181_s1 + $0x8] sm:$0xff]  ;;  %v14_v3 = vld [vmem:[%s2181_s1 + $0x10] sm:$0xff]  ;;  %1653 = vmatprep.mubr.msk.f32.mxu0 %vm1855_vm0, %v1856_v4  ;;  %v1859_v38 = vmov 1966171168   ;;  %vm322_vm4 = vcmask 261120  }
   0x2   :  { %v1675_v5 = vpack.c.bf16 %v1903_v2, %v1898_v1  ;;  %v15_v6 = vld [vmem:[%s2181_s1 + $0x18] sm:$0xff]  ;;  %v16_v8 = vld [vmem:[%s2181_s1 + $0x20] sm:$0xff]  ;;  %v17_v9 = vld [vmem:[%s2181_s1 + $0x28] sm:$0xff]  ;;  %v1953_v33 = vand.u32 127, %v98_v32  ;;  %v146_v39 = vunpack.c.l.s4 %v1859_v38  ;;  %v1965_v44 = vshrl.u32 %v98_v32, 7 }
   0x3   :  { %v1678_v7 = vpack.c.bf16 %v15_v6, %v14_v3  ;;  %v1681_v10 = vpack.c.bf16 %v17_v9, %v16_v8  ;;  %v18_v11 = vld [vmem:[%s2181_s1 + $0x30] sm:$0xff]  ;;  %v19_v12 = vld [vmem:[%s2181_s1 + $0x38] sm:$0xff]  ;;  %v20_v14 = vld [vmem:[%s2181_s1 + $0x40] sm:$0xff] }
   0x4   :  { %1676 = vmatpush3.bf16.msra.mxu0 %v1675_v5  ;;  %v1684_v13 = vpack.c.bf16 %v19_v12, %v18_v11  ;;  %v21_v15 = vld [vmem:[%s2181_s1 + $0x48] sm:$0xff]  ;;  %v22_v17 = vld [vmem:[%s2181_s1 + $0x50] sm:$0xff]  ;;  %v23_v18 = vld [vmem:[%s2181_s1 + $0x58] sm:$0xff]  ;;  %vm100_vm1 = vcmp.ge.s32.totalorder %v1953_v33, 64  ;;  %vm101_vm2 = vcmp.lt.s32.totalorder %v1953_v33, 96  ;;  %v147_v45 = vunpack.c.0.s8 %v146_v39 }
   0x5   :  { %1677 = vmatprep.subr.bf16.mxu0 %v1854_v0  ;;  %v1687_v16 = vpack.c.bf16 %v21_v15, %v20_v14  ;;  %v1690_v19 = vpack.c.bf16 %v23_v18, %v22_v17  ;;  %v24_v20 = vld [vmem:[%s2181_s1 + $0x60] sm:$0xff]  ;;  %v25_v21 = vld [vmem:[%s2181_s1 + $0x68] sm:$0xff]  ;;  %v26_v23 = vld [vmem:[%s2181_s1 + $0x70] sm:$0xff]  ;;  %v1972_v55 = vsub.s32 0, %v1965_v44  ;;  %vm498_vm6 = vcmp.lt.s32.totalorder %v1953_v33, 16 }
   0x6   :  { %v1693_v22 = vpack.c.bf16 %v25_v21, %v24_v20  ;;  %v27_v24 = vld [vmem:[%s2181_s1 + $0x78] sm:$0xff]  ;;  %v11_v26 = vld [vmem:[%s2182_s0] sm:$0x3]  ;;  %vm102_vm3 = vmand %vm100_vm1, %vm101_vm2  ;;  %s1857_s0 = smov 64   ;;  %s1858_s1 = smov 104   ;;  %v150_v50 = vsub.s32 %v147_v45, %v1965_v44  ;;  %vm492_vm7 = vcmp.eq.s32.totalorder %v1965_v44, %v1953_v33  ;;  %vm524_vm8 = vcmp.eq.s32.totalorder %v1965_v44, 0 }
   0x7   :  { %v1696_v25 = vpack.c.bf16 %v27_v24, %v26_v23  ;;  %vm2004_vm5 = vmpackc.low %vm322_vm4, %vm322_vm4  ;;  %vm586_vm10 = vcmp.eq.s32.totalorder %v1965_v44, 1  ;;  %vm648_vm11 = vcmp.eq.s32.totalorder %v1965_v44, 2  ;;  %vm710_vm12 = vcmp.eq.s32.totalorder %v1965_v44, 3 }
   0x8   :  { %1679 = vmatpush3.bf16.msra.mxu0 %v1678_v7  ;;  %vm772_vm13 = vcmp.eq.s32.totalorder %v1965_v44, 4  ;;  %vm834_vm14 = vcmp.eq.s32.totalorder %v1965_v44, 5  ;;  %vm896_vm15 = vcmp.eq.s32.totalorder %v1965_v44, 6  ;;  %vm958_vm1 = vcmp.eq.s32.totalorder %v1965_v44, 7 }
   0x9   :  { %1680 = vmatprep.subr.bf16.mxu0 %v1854_v0 }
   0xc   :  { %1682 = vmatpush3.bf16.msra.mxu0 %v1681_v10 }
   0xd   :  { %1683 = vmatprep.subr.bf16.mxu0 %v1854_v0 }
  0x10   :  { %1685 = vmatpush3.bf16.msra.mxu0 %v1684_v13 }
  0x11   :  { %1686 = vmatprep.subr.bf16.mxu0 %v1854_v0 }
  0x14   :  { %1688 = vmatpush3.bf16.msra.mxu0 %v1687_v16 }
  0x15   :  { %1689 = vmatprep.subr.bf16.mxu0 %v1854_v0 }
  0x18   :  { %1691 = vmatpush3.bf16.msra.mxu0 %v1690_v19 }
  0x19   :  { %1692 = vmatprep.subr.bf16.mxu0 %v1854_v0 }
  0x1c   :  { %1694 = vmatpush3.bf16.msra.mxu0 %v1693_v22 }
  0x1d   :  { %1695 = vmatprep.subr.bf16.mxu0 %v1854_v0 }
  0x20   :  { %1697 = vmatpush3.bf16.msra.mxu0 %v1696_v25 }
  0x23   :  { %1654 = vmatmul.mubr.f32.vlgmr.msra.gmra.mrb[0].mxu0 %v11_v26 }
  0xf6   :  { %v94_v27 = vpop.f32.mrb[0].mxu0 }
  0xf7   :  { %v1564_v28 = vmul.f32 -1.442695, %v94_v27  ;;  %v1655_v29 = vpop.f32.mrb[1].mxu0 }
  0xf9   :  { %1784 = vpow2.f32 %v1564_v28 }
 0x103   :  { %v1785_v30 = vpop.eup %1784 }
 0x104   :  { %v106_v31 = vadd.f32 1.0, %v1785_v30 }
 0x106   :  { %1786 = vrcp.f32 %v106_v31 }
 0x110   :  { %v1787_v34 = vpop.eup %1786 }
 0x111   :  { %v109_v35 = vmul.f32 2.0, %v1787_v34 }
 0x113   :  { %v1565_v36 = vadd.f32 -1.0, %v109_v35 }
 0x115   :  { %v1957_v37 = vsel %vm102_vm3, %v1565_v36, %v1787_v34 }
 0x116   :  { %118 = vrot.lane.b32.xlu0 %v1957_v37, %s1857_s0  ;;  %v133_v42 = vsub.f32 1.0, %v1957_v37  ;;  %v137_v43 = vmul.f32 %v1957_v37, %v1957_v37  ;;  %v136_v5 = vmul.f32 0.5, %v1957_v37 }
 0x118   :  { %v138_v49 = vsub.f32 1.0, %v137_v43 }
 0x11a   :  { %113 = vrot.lane.b32.xlu0 %v11_v26, %s1858_s1 }
 0x188   :  { %v119_v40 = vpop.permute.xlu0 %118 }
 0x189   :  { %v121_v41 = vmul.f32 %v119_v40, %v1957_v37 }
 0x18b   :  { %v134_v46 = vmul.f32 %v133_v42, %v121_v41  ;;  %123 = vrot.lane.b32.xlu1 %v121_v41, %s1860_s15 }
 0x18c   :  { %v114_v47 = vpop.permute.xlu0 %113 }
 0x18d   :  { %v116_v48 = vmul.f32 %v114_v47, %v1957_v37  ;;  %v151_v6 = vrot.slane %v134_v46, %v150_v50 }
 0x18f   :  { %v135_v51 = vmul.f32 %v133_v42, %v116_v48  ;;  %140 = vrot.lane.b32.xlu1 %v138_v49, %s1857_s0  ;;  %v159_v14 = vrot.slane %v151_v6, %v150_v50  ;;  %v152_v15 = vcombine.high %v151_v6, %v151_v6 }
 0x191   :  { %v188_v52 = vrot.slane %v135_v51, %v150_v50  ;;  %v170_v18 = vrot.slane %v159_v14, %v1972_v55  ;;  %v166_v21 = vrot.slane %v152_v15, %v150_v50 }
 0x193   :  { %v189_v53 = vcombine.high %v188_v52, %v188_v52  ;;  %v196_v54 = vrot.slane %v188_v52, %v150_v50  ;;  %v178_v24 = vmul.f32 %v170_v18, %v1903_v2  ;;  %v177_v25 = vmul.f32 %v170_v18, %v1898_v1 }
 0x194   :  { %v174_v28 = vrot.slane %v166_v21, %v1972_v55 }
 0x195   :  { %v207_v56 = vrot.slane %v196_v54, %v1972_v55  ;;  %v203_v59 = vrot.slane %v189_v53, %v150_v50  ;;  %v1862_v53 = vmov 0   ;;  %v1863_v54 = vmov 1.0  }
 0x196   :  { %v180_v40 = vmul.f32 %v174_v28, %v1903_v2  ;;  %v179_v41 = vmul.f32 %v174_v28, %v1898_v1  ;;  %1736 = vset.pattern.permute.xlu0 %v1862_v53  ;;  %1737 = vset.pattern.permute.xlu1 %v1862_v53 }
 0x197   :  { %v215_v57 = vmul.f32 %v207_v56, %v1903_v2  ;;  %v214_v58 = vmul.f32 %v207_v56, %v1898_v1  ;;  %v211_v60 = vrot.slane %v203_v59, %v1972_v55  ;;  %v499_v56 = vsel %vm498_vm6, 0.5, %v1863_v54 }
 0x198   :  { %v1580_v54 = vsel %vm648_vm11, 1.0, %v1856_v4  ;;  %vm1557_vm11 = vcmask 523264  }
 0x199   :  { %224 = vrot.lane.b32.xlu1 %v215_v57, %s1861_s16  ;;  %222 = vrot.lane.b32.xlu0 %v214_v58, %s1861_s16  ;;  %v217_v61 = vmul.f32 %v211_v60, %v1903_v2  ;;  %v216_v62 = vmul.f32 %v211_v60, %v1898_v1  ;;  %v1576_v60 = vsel %vm492_vm7, 1.0, %v1856_v4 }
 0x19d   :  { %275 = vrot.lane.b32.xlu1 %v1903_v2, %s1857_s0  ;;  %273 = vrot.lane.b32.xlu0 %v1898_v1, %s1857_s0 }
 0x1a1   :  { %228 = vrot.lane.b32.xlu1 %v217_v61, %s1861_s16  ;;  %226 = vrot.lane.b32.xlu0 %v216_v62, %s1861_s16 }
 0x1fd   :  { %v124_v63 = vpop.permute.xlu1 %123 }
 0x1fe   :  { %v1984_v0 = vadd.f32 %v124_v63, %v116_v48 }
 0x200   :  { %v294_v3 = vrot.slane %v1984_v0, %v150_v50 }
 0x201   :  { %v141_v7 = vpop.permute.xlu1 %140 }
 0x202   :  { %v143_v8 = vmul.f32 %v141_v7, %v136_v5  ;;  %v302_v9 = vrot.slane %v294_v3, %v150_v50  ;;  %v295_v10 = vcombine.high %v294_v3, %v294_v3 }
 0x204   :  { %v245_v11 = vrot.slane %v143_v8, %v150_v50  ;;  %v313_v12 = vrot.slane %v302_v9, %v1972_v55  ;;  %v309_v13 = vrot.slane %v295_v10, %v150_v50  ;;  %v1578_v9 = vsel %vm524_vm8, 1.0, %v1856_v4 }
 0x206   :  { %v246_v16 = vcombine.high %v245_v11, %v245_v11  ;;  %318 = vrot.lane.b32.xlu0 %v313_v12, %s1861_s16  ;;  %v317_v17 = vrot.slane %v309_v13, %v1972_v55  ;;  %v253_v19 = vrot.slane %v245_v11, %v150_v50  ;;  %v1864_v13 = vmov 1  }
 0x208   :  { %320 = vrot.lane.b32.xlu1 %v317_v17, %s1861_s16  ;;  %v260_v20 = vrot.slane %v246_v16, %v150_v50  ;;  %v264_v26 = vrot.slane %v253_v19, %v1972_v55 }
 0x20a   :  { %v268_v27 = vrot.slane %v260_v20, %v1972_v55 }
 0x20b   :  { %v225_v22 = vpop.permute.xlu1 %224  ;;  %v223_v23 = vpop.permute.xlu0 %222 }
 0x20c   :  { %v235_v29 = vadd.f32 %v225_v22, %v178_v24  ;;  %v234_v32 = vadd.f32 %v223_v23, %v177_v25 }
 0x20f   :  { %v276_v30 = vpop.permute.xlu1 %275  ;;  %v274_v31 = vpop.permute.xlu0 %273 }
 0x210   :  { %v280_v34 = vmul.f32 %v276_v30, %v264_v26  ;;  %v279_v35 = vmul.f32 %v274_v31, %v264_v26  ;;  %v281_v36 = vmul.f32 %v274_v31, %v268_v27  ;;  %v282_v46 = vmul.f32 %v276_v30, %v268_v27 }
 0x211   :  { %v2049_v26 = vadd.s32 8, %v1965_v44  ;;  %v1579_v30 = vsel %vm586_vm10, 1.0, %v1856_v4  ;;  %vm1546_vm10 = vcmask 1041409  }
 0x212   :  { %v1996_v38 = vadd.f32 %v280_v34, %v235_v29  ;;  %v1998_v39 = vadd.f32 %v279_v35, %v234_v32 }
 0x213   :  { %v229_v42 = vpop.permute.xlu1 %228  ;;  %v227_v43 = vpop.permute.xlu0 %226  ;;  %vm493_vm9 = vcmp.eq.s32.totalorder %v2049_v26, %v1953_v33  ;;  %v1865_v33 = vmov 2   ;;  %vm1021_vm0 = vcmp.eq.s32.totalorder %v2049_v26, 8  ;;  %vm1083_vm2 = vcmp.eq.s32.totalorder %v2049_v26, 9 }
 0x214   :  { %v237_v47 = vadd.f32 %v229_v42, %v180_v40  ;;  %v236_v48 = vadd.f32 %v227_v43, %v179_v41  ;;  %1662 = vmatprep.mubr.msk.f32.mxu1 %vm322_vm4, %v1998_v39  ;;  %v1698_v49 = vpack.c.bf16 %v1996_v38, %v1998_v39  ;;  %v1577_v29 = vsel %vm493_vm9, 1.0, %v1856_v4 }
 0x215   :  { %vm1145_vm3 = vcmp.eq.s32.totalorder %v2049_v26, 10  ;;  %vm1269_vm6 = vcmp.eq.s32.totalorder %v2049_v26, 12  ;;  %vm1331_vm7 = vcmp.eq.s32.totalorder %v2049_v26, 13  ;;  %vm1393_vm8 = vcmp.eq.s32.totalorder %v2049_v26, 14 }
 0x216   :  { %v2012_v2 = vadd.f32 %v282_v46, %v237_v47  ;;  %v2014_v1 = vadd.f32 %v281_v36, %v236_v48  ;;  %1700 = vmatprep.subr.msk.bf16.mxu1 %vm2004_vm5, %v1698_v49  ;;  %v2059_v36 = vsub.s32 1, %v1965_v44  ;;  %vm1455_vm9 = vcmp.eq.s32.totalorder %v2049_v26, 15 }
 0x217   :  { %1703 = vmatpush3.bf16.xpose.msk.msra.mxu1 %vm2004_vm5, %v1698_v49 }
 0x218   :  { %v1704_v51 = vpack.c.bf16 %v2012_v2, %v2014_v1 }
 0x278   :  { %v319_v50 = vpop.permute.xlu0 %318 }
 0x279   :  { %1660 = vmatprep.subr.msk.mxu1 %vm322_vm4, %v319_v50 }
 0x27a   :  { %1661 = vmatpush3.xpose.msk.msra.mxu1 %vm322_vm4, %v319_v50  ;;  %v321_v52 = vpop.permute.xlu1 %320 }
 0x27b   :  { %1706 = vmatprep.subr.msk.bf16.mxu1 %vm2004_vm5, %v1704_v51 }
 0x27d   :  { %1663 = vmatmul.mubr.msk.f32.vlgmr.msra.gmra.mrb[0].mxu1 %vm322_vm4, %v1996_v38 }
 0x27e   :  { %1709 = vmatpush3.bf16.xpose.msk.msra.mxu1 %vm2004_vm5, %v1704_v51  ;;  %1671 = vmatprep.mubr.msk.f32.mxu1 %vm322_vm4, %v2014_v1  ;;  %vm1207_vm5 = vcmp.eq.s32.totalorder %v2049_v26, 11  ;;  %v1879_v26 = vmov 16  }
 0x27f   :  { %1669 = vmatprep.subr.msk.mxu1 %vm322_vm4, %v321_v52 }
 0x286   :  { %1670 = vmatpush3.xpose.msk.msra.mxu1 %vm322_vm4, %v321_v52 }
 0x289   :  { %1672 = vmatmul.mubr.msk.f32.vlgmr.msra.gmra.mrb[2].mxu1 %vm322_vm4, %v2012_v2 }
 0x350   :  { %v1664_v57 = vpop.f32.mrb[0].mxu1 }
 0x351   :  { %v501_v58 = vmul.f32 %v1664_v57, %v499_v56  ;;  %v397_v59 = vpop.f32.mrb[1].mxu1 }
 0x352   :  { %v500_v61 = vmul.f32 %v499_v56, %v397_v59 }
 0x353   :  { %v505_v31 = vadd.f32 %v1577_v29, %v501_v58 }
 0x354   :  { %v504_v62 = vadd.f32 %v1576_v60, %v500_v61 }
 0x356   :  { %1788 = vrcp.f32 %v504_v62  ;;  %v530_v12 = vsub.f32 %v504_v62, %v1578_v9 }
 0x35c   :  { %v1673_v63 = vpop.f32.mrb[2].mxu1 }
 0x35d   :  { %v503_v3 = vmul.f32 %v1673_v63, %v499_v56  ;;  %v480_v5 = vpop.f32.mrb[3].mxu1 }
 0x35e   :  { %v502_v6 = vmul.f32 %v499_v56, %v480_v5  ;;  %v2068_v5 = vsub.s32 2, %v1965_v44 }
 0x35f   :  { %v507_v35 = vadd.f32 %v1577_v29, %v503_v3 }
 0x360   :  { %v1789_v7 = vpop.eup %1788  ;;  %v506_v8 = vadd.f32 %v1576_v60, %v502_v6 }
 0x361   :  { %514 = vperm.xlu0 %1736, %v1789_v7  }
 0x362   :  { %1790 = vrcp.f32 %v506_v8  ;;  %v532_v10 = vsub.f32 %v506_v8, %v1578_v9 }
 0x365   :  { %546 = vperm.xlu0 %1736, %v532_v10  }
 0x369   :  { %1739 = vset.pattern.permute.xlu0 %v1864_v13 }
 0x36c   :  { %v1791_v11 = vpop.eup %1790 }
 0x36d   :  { %519 = vperm.xlu1 %1737, %v1791_v11  }
 0x371   :  { %536 = vperm.xlu1 %1737, %v530_v12  }
 0x375   :  { %1738 = vset.pattern.permute.xlu1 %v1864_v13 }
 0x3e0   :  { %v515_v14 = vpop.permute.xlu0 %514 }
 0x3e1   :  { %v522_v15 = vmul.f32 %v515_v14, %v504_v62 }
 0x3e3   :  { %v557_v18 = vrot.slane %v522_v15, %v1972_v55 }
 0x3e4   :  { %v547_v20 = vpop.permute.xlu0 %546 }
 0x3ec   :  { %v520_v16 = vpop.permute.xlu1 %519 }
 0x3ed   :  { %v523_v17 = vmul.f32 %v520_v16, %v506_v8 }
 0x3ef   :  { %v561_v19 = vrot.slane %v523_v17, %v1972_v55 }
 0x3f0   :  { %v537_v21 = vpop.permute.xlu1 %536 }
 0x3f1   :  { %v564_v22 = vmul.f32 %v561_v19, %v547_v20  ;;  %v562_v23 = vmul.f32 %v557_v18, %v537_v21 }
 0x3f3   :  { %v568_v24 = vsub.f32 %v506_v8, %v564_v22  ;;  %v566_v25 = vsub.f32 %v504_v62, %v562_v23 }
 0x3f5   :  { %1792 = vrcp.f32 %v568_v24  ;;  %v592_v32 = vsub.f32 %v566_v25, %v1579_v30  ;;  %v594_v34 = vsub.f32 %v568_v24, %v1579_v30 }
 0x3f6   :  { %1794 = vrcp.f32 %v566_v25 }
 0x3ff   :  { %v1793_v27 = vpop.eup %1792 }
 0x400   :  { %v1795_v28 = vpop.eup %1794  ;;  %581 = vperm.xlu0 %1739, %v1793_v27  }
 0x401   :  { %576 = vperm.xlu1 %1738, %v1795_v28  }
 0x404   :  { %1740 = vset.pattern.permute.xlu0 %v1862_v53 }
 0x405   :  { %598 = vperm.xlu1 %1738, %v592_v32   ;;  %541 = vperm.xlu0 %1740, %v505_v31  }
 0x409   :  { %608 = vperm.xlu1 %1738, %v594_v34   ;;  %1743 = vset.pattern.permute.xlu0 %v1865_v33 }
 0x40d   :  { %1741 = vset.pattern.permute.xlu1 %v1862_v53 }
 0x40e   :  { %551 = vperm.xlu1 %1741, %v507_v35  }
 0x412   :  { %1742 = vset.pattern.permute.xlu1 %v1865_v33 }
 0x47f   :  { %v582_v40 = vpop.permute.xlu0 %581 }
 0x480   :  { %v577_v41 = vpop.permute.xlu1 %576  ;;  %v585_v43 = vmul.f32 %v582_v40, %v568_v24  ;;  %v2075_v40 = vsub.s32 3, %v1965_v44 }
 0x481   :  { %v584_v42 = vmul.f32 %v577_v41, %v566_v25 }
 0x482   :  { %v623_v48 = vrot.slane %v585_v43, %v2059_v36 }
 0x483   :  { %v619_v45 = vrot.slane %v584_v42, %v2059_v36 }
 0x484   :  { %v599_v46 = vpop.permute.xlu1 %598  ;;  %v542_v56 = vpop.permute.xlu0 %541 }
 0x485   :  { %v624_v47 = vmul.f32 %v619_v45, %v599_v46  ;;  %v563_v59 = vmul.f32 %v557_v18, %v542_v56 }
 0x487   :  { %v628_v49 = vsub.f32 %v566_v25, %v624_v47  ;;  %v567_v62 = vsub.f32 %v505_v31, %v563_v59  ;;  %v1581_v25 = vsel %vm710_vm12, 1.0, %v1856_v4  ;;  %v1867_v47 = vmov 4  }
 0x488   :  { %v609_v50 = vpop.permute.xlu1 %608 }
 0x489   :  { %1796 = vrcp.f32 %v628_v49  ;;  %v626_v51 = vmul.f32 %v623_v48, %v609_v50  ;;  %v654_v57 = vsub.f32 %v628_v49, %v1580_v54 }
 0x48b   :  { %v630_v52 = vsub.f32 %v568_v24, %v626_v51  ;;  %v1866_v24 = vmov 3  }
 0x48d   :  { %1798 = vrcp.f32 %v630_v52  ;;  %v552_v60 = vpop.permute.xlu1 %551  ;;  %v656_v61 = vsub.f32 %v630_v52, %v1580_v54 }
 0x48e   :  { %v565_v63 = vmul.f32 %v561_v19, %v552_v60 }
 0x490   :  { %v569_v3 = vsub.f32 %v507_v35, %v565_v63 }
 0x493   :  { %v1797_v53 = vpop.eup %1796 }
 0x494   :  { %638 = vperm.xlu1 %1742, %v1797_v53  }
 0x497   :  { %v1799_v58 = vpop.eup %1798 }
 0x498   :  { %660 = vperm.xlu1 %1742, %v654_v57   ;;  %643 = vperm.xlu0 %1743, %v1799_v58   ;;  %v1582_v58 = vsel %vm772_vm13, 1.0, %v1856_v4 }
 0x49c   :  { %670 = vperm.xlu1 %1742, %v656_v61   ;;  %1744 = vset.pattern.permute.xlu0 %v1864_v13 }
 0x49d   :  { %603 = vperm.xlu0 %1744, %v567_v62  }
 0x4a0   :  { %1745 = vset.pattern.permute.xlu1 %v1864_v13 }
 0x4a1   :  { %613 = vperm.xlu1 %1745, %v569_v3   ;;  %1747 = vset.pattern.permute.xlu0 %v1865_v33 }
 0x4a5   :  { %1746 = vset.pattern.permute.xlu1 %v1865_v33 }
 0x513   :  { %v639_v6 = vpop.permute.xlu1 %638 }
 0x514   :  { %v646_v7 = vmul.f32 %v639_v6, %v628_v49 }
 0x516   :  { %v681_v8 = vrot.slane %v646_v7, %v2068_v5 }
 0x517   :  { %v644_v9 = vpop.permute.xlu0 %643  ;;  %v661_v10 = vpop.permute.xlu1 %660 }
 0x518   :  { %v647_v11 = vmul.f32 %v644_v9, %v630_v52  ;;  %v686_v12 = vmul.f32 %v681_v8, %v661_v10  ;;  %v1868_v9 = vmov 5   ;;  %v2082_v10 = vsub.s32 4, %v1965_v44 }
 0x51a   :  { %v685_v14 = vrot.slane %v647_v11, %v2068_v5  ;;  %v690_v15 = vsub.f32 %v628_v49, %v686_v12 }
 0x51b   :  { %v671_v16 = vpop.permute.xlu1 %670 }
 0x51c   :  { %1800 = vrcp.f32 %v690_v15  ;;  %v688_v13 = vmul.f32 %v685_v14, %v671_v16  ;;  %v604_v17 = vpop.permute.xlu0 %603  ;;  %v716_v28 = vsub.f32 %v690_v15, %v1581_v25 }
 0x51d   :  { %v625_v18 = vmul.f32 %v619_v45, %v604_v17 }
 0x51e   :  { %v692_v19 = vsub.f32 %v630_v52, %v688_v13 }
 0x51f   :  { %v629_v20 = vsub.f32 %v567_v62, %v625_v18 }
 0x520   :  { %1802 = vrcp.f32 %v692_v19  ;;  %v614_v21 = vpop.permute.xlu1 %613  ;;  %v718_v30 = vsub.f32 %v692_v19, %v1581_v25 }
 0x521   :  { %v627_v22 = vmul.f32 %v623_v48, %v614_v21  ;;  %665 = vperm.xlu1 %1746, %v629_v20  }
 0x523   :  { %v631_v23 = vsub.f32 %v569_v3, %v627_v22 }
 0x525   :  { %675 = vperm.xlu0 %1747, %v631_v23   ;;  %1749 = vset.pattern.permute.xlu1 %v1866_v24 }
 0x526   :  { %v1801_v27 = vpop.eup %1800 }
 0x527   :  { %700 = vperm.xlu1 %1749, %v1801_v27  }
 0x529   :  { %1748 = vset.pattern.permute.xlu0 %v1866_v24  ;;  %v1583_v24 = vsel %vm834_vm14, 1.0, %v1856_v4 }
 0x52a   :  { %v1803_v29 = vpop.eup %1802  ;;  %722 = vperm.xlu0 %1748, %v716_v28  }
 0x52b   :  { %705 = vperm.xlu1 %1749, %v1803_v29  }
 0x52f   :  { %732 = vperm.xlu1 %1749, %v718_v30  }
 0x5a0   :  { %v666_v31 = vpop.permute.xlu1 %665 }
 0x5a1   :  { %v687_v32 = vmul.f32 %v681_v8, %v666_v31 }
 0x5a3   :  { %v691_v34 = vsub.f32 %v629_v20, %v687_v32 }
 0x5a4   :  { %v676_v35 = vpop.permute.xlu0 %675 }
 0x5a5   :  { %v689_v33 = vmul.f32 %v685_v14, %v676_v35  ;;  %727 = vperm.xlu1 %1749, %v691_v34  }
 0x5a6   :  { %v701_v41 = vpop.permute.xlu1 %700 }
 0x5a7   :  { %v693_v42 = vsub.f32 %v631_v23, %v689_v33  ;;  %v708_v43 = vmul.f32 %v701_v41, %v690_v15  ;;  %v1869_v33 = vmov 6  }
 0x5a9   :  { %737 = vperm.xlu0 %1748, %v693_v42   ;;  %v723_v45 = vpop.permute.xlu0 %722  ;;  %v743_v46 = vrot.slane %v708_v43, %v2075_v40  ;;  %1750 = vset.pattern.permute.xlu1 %v1867_v47  ;;  %v2089_v43 = vsub.s32 5, %v1965_v44 }
 0x5aa   :  { %v706_v48 = vpop.permute.xlu1 %705 }
 0x5ab   :  { %v748_v49 = vmul.f32 %v743_v46, %v723_v45  ;;  %v709_v50 = vmul.f32 %v706_v48, %v692_v19 }
 0x5ad   :  { %v752_v51 = vsub.f32 %v690_v15, %v748_v49  ;;  %v747_v52 = vrot.slane %v709_v50, %v2075_v40  ;;  %1751 = vset.pattern.permute.xlu0 %v1867_v47 }
 0x5ae   :  { %v733_v53 = vpop.permute.xlu1 %732 }
 0x5af   :  { %1804 = vrcp.f32 %v752_v51  ;;  %v750_v54 = vmul.f32 %v747_v52, %v733_v53  ;;  %v778_v59 = vsub.f32 %v752_v51, %v1582_v58 }
 0x5b1   :  { %v754_v56 = vsub.f32 %v692_v19, %v750_v54 }
 0x5b3   :  { %1806 = vrcp.f32 %v754_v56  ;;  %v780_v61 = vsub.f32 %v754_v56, %v1582_v58  ;;  %v1584_v58 = vsel %vm896_vm15, 1.0, %v1856_v4 }
 0x5b9   :  { %v1805_v57 = vpop.eup %1804 }
 0x5ba   :  { %762 = vperm.xlu1 %1750, %v1805_v57  }
 0x5bd   :  { %v1807_v60 = vpop.eup %1806 }
 0x5be   :  { %784 = vperm.xlu1 %1750, %v778_v59   ;;  %767 = vperm.xlu0 %1751, %v1807_v60  }
 0x5c2   :  { %794 = vperm.xlu1 %1750, %v780_v61  }
 0x624   :  { %v728_v62 = vpop.permute.xlu1 %727 }
 0x625   :  { %v749_v63 = vmul.f32 %v743_v46, %v728_v62 }
 0x627   :  { %v753_v3 = vsub.f32 %v691_v34, %v749_v63 }
 0x628   :  { %v738_v6 = vpop.permute.xlu0 %737 }
 0x629   :  { %v751_v7 = vmul.f32 %v747_v52, %v738_v6  ;;  %789 = vperm.xlu0 %1751, %v753_v3  }
 0x62b   :  { %v755_v8 = vsub.f32 %v693_v42, %v751_v7 }
 0x62d   :  { %799 = vperm.xlu1 %1750, %v755_v8   ;;  %1752 = vset.pattern.permute.xlu0 %v1868_v9 }
 0x631   :  { %1753 = vset.pattern.permute.xlu1 %v1868_v9  ;;  %v2098_v9 = vsub.s32 6, %v1965_v44 }
 0x639   :  { %v763_v11 = vpop.permute.xlu1 %762 }
 0x63a   :  { %v770_v12 = vmul.f32 %v763_v11, %v752_v51 }
 0x63c   :  { %v805_v14 = vrot.slane %v770_v12, %v2082_v10 }
 0x63d   :  { %v768_v15 = vpop.permute.xlu0 %767  ;;  %v785_v16 = vpop.permute.xlu1 %784 }
 0x63e   :  { %v771_v13 = vmul.f32 %v768_v15, %v754_v56  ;;  %v810_v17 = vmul.f32 %v805_v14, %v785_v16 }
 0x640   :  { %v814_v18 = vsub.f32 %v752_v51, %v810_v17  ;;  %v809_v19 = vrot.slane %v771_v13, %v2082_v10 }
 0x641   :  { %v795_v20 = vpop.permute.xlu1 %794 }
 0x642   :  { %1808 = vrcp.f32 %v814_v18  ;;  %v812_v21 = vmul.f32 %v809_v19, %v795_v20  ;;  %v840_v28 = vsub.f32 %v814_v18, %v1583_v24 }
 0x644   :  { %v816_v22 = vsub.f32 %v754_v56, %v812_v21 }
 0x646   :  { %1810 = vrcp.f32 %v816_v22  ;;  %v842_v25 = vsub.f32 %v816_v22, %v1583_v24 }
 0x64c   :  { %v1809_v23 = vpop.eup %1808 }
 0x64d   :  { %824 = vperm.xlu0 %1752, %v1809_v23  }
 0x650   :  { %v1811_v27 = vpop.eup %1810 }
 0x651   :  { %856 = vperm.xlu0 %1752, %v842_v25   ;;  %829 = vperm.xlu1 %1753, %v1811_v27  }
 0x655   :  { %846 = vperm.xlu1 %1753, %v840_v28  }
 0x6a8   :  { %v790_v29 = vpop.permute.xlu0 %789 }
 0x6a9   :  { %v811_v30 = vmul.f32 %v805_v14, %v790_v29 }
 0x6ab   :  { %v815_v31 = vsub.f32 %v753_v3, %v811_v30 }
 0x6ac   :  { %v800_v32 = vpop.permute.xlu1 %799 }
 0x6ad   :  { %v813_v34 = vmul.f32 %v809_v19, %v800_v32  ;;  %851 = vperm.xlu1 %1753, %v815_v31   ;;  %v1871_v32 = vmov 8  }
 0x6af   :  { %v817_v35 = vsub.f32 %v755_v8, %v813_v34  ;;  %v1870_v8 = vmov 7  }
 0x6b1   :  { %861 = vperm.xlu0 %1752, %v817_v35   ;;  %1754 = vset.pattern.permute.xlu1 %v1869_v33 }
 0x6b5   :  { %1755 = vset.pattern.permute.xlu0 %v1869_v33  ;;  %v2112_v33 = vsub.s32 7, %v1965_v44 }
 0x6cc   :  { %v825_v41 = vpop.permute.xlu0 %824 }
 0x6cd   :  { %v832_v42 = vmul.f32 %v825_v41, %v814_v18 }
 0x6cf   :  { %v867_v48 = vrot.slane %v832_v42, %v2089_v43 }
 0x6d0   :  { %v830_v45 = vpop.permute.xlu1 %829  ;;  %v857_v49 = vpop.permute.xlu0 %856 }
 0x6d1   :  { %v833_v46 = vmul.f32 %v830_v45, %v816_v22 }
 0x6d3   :  { %v871_v47 = vrot.slane %v833_v46, %v2089_v43 }
 0x6d4   :  { %v847_v50 = vpop.permute.xlu1 %846 }
 0x6d5   :  { %v874_v51 = vmul.f32 %v871_v47, %v857_v49  ;;  %v872_v52 = vmul.f32 %v867_v48, %v847_v50 }
 0x6d7   :  { %v878_v53 = vsub.f32 %v816_v22, %v874_v51  ;;  %v876_v54 = vsub.f32 %v814_v18, %v872_v52 }
 0x6d9   :  { %1812 = vrcp.f32 %v878_v53  ;;  %v902_v59 = vsub.f32 %v876_v54, %v1584_v58  ;;  %v904_v60 = vsub.f32 %v878_v53, %v1584_v58  ;;  %v1585_v58 = vsel %vm958_vm1, 1.0, %v1856_v4 }
 0x6da   :  { %1814 = vrcp.f32 %v876_v54 }
 0x6e3   :  { %v1813_v56 = vpop.eup %1812 }
 0x6e4   :  { %v1815_v57 = vpop.eup %1814  ;;  %891 = vperm.xlu0 %1755, %v1813_v56  }
 0x6e5   :  { %886 = vperm.xlu1 %1754, %v1815_v57  }
 0x6e9   :  { %908 = vperm.xlu1 %1754, %v902_v59  }
 0x6ed   :  { %918 = vperm.xlu1 %1754, %v904_v60  }
 0x72c   :  { %v852_v61 = vpop.permute.xlu1 %851 }
 0x72d   :  { %v873_v62 = vmul.f32 %v867_v48, %v852_v61 }
 0x72f   :  { %v877_v63 = vsub.f32 %v815_v31, %v873_v62  ;;  %v1872_v62 = vmov 9  }
 0x730   :  { %v862_v3 = vpop.permute.xlu0 %861 }
 0x731   :  { %v875_v6 = vmul.f32 %v871_v47, %v862_v3  ;;  %913 = vperm.xlu0 %1755, %v877_v63  }
 0x733   :  { %v879_v7 = vsub.f32 %v817_v35, %v875_v6 }
 0x735   :  { %923 = vperm.xlu1 %1754, %v879_v7   ;;  %1756 = vset.pattern.permute.xlu0 %v1870_v8 }
 0x739   :  { %1757 = vset.pattern.permute.xlu1 %v1870_v8 }
 0x763   :  { %v892_v11 = vpop.permute.xlu0 %891 }
 0x764   :  { %v887_v12 = vpop.permute.xlu1 %886  ;;  %v895_v15 = vmul.f32 %v892_v11, %v878_v53 }
 0x765   :  { %v894_v14 = vmul.f32 %v887_v12, %v876_v54 }
 0x766   :  { %v933_v19 = vrot.slane %v895_v15, %v2098_v9 }
 0x767   :  { %v929_v16 = vrot.slane %v894_v14, %v2098_v9 }
 0x768   :  { %v909_v13 = vpop.permute.xlu1 %908 }
 0x769   :  { %v934_v17 = vmul.f32 %v929_v16, %v909_v13 }
 0x76b   :  { %v2101_v18 = vsub.f32 %v876_v54, %v934_v17  ;;  %v1586_v54 = vsel %vm1021_vm0, 1.0, %v1856_v4 }
 0x76c   :  { %v919_v20 = vpop.permute.xlu1 %918 }
 0x76d   :  { %1816 = vrcp.f32 %v2101_v18  ;;  %v936_v21 = vmul.f32 %v933_v19, %v919_v20  ;;  %v964_v60 = vsub.f32 %v2101_v18, %v1585_v58 }
 0x76f   :  { %v2105_v22 = vsub.f32 %v878_v53, %v936_v21 }
 0x771   :  { %1818 = vrcp.f32 %v2105_v22  ;;  %v966_v61 = vsub.f32 %v2105_v22, %v1585_v58 }
 0x777   :  { %v1817_v23 = vpop.eup %1816 }
 0x778   :  { %948 = vperm.xlu0 %1756, %v1817_v23  }
 0x77b   :  { %v1819_v24 = vpop.eup %1818 }
 0x77c   :  { %953 = vperm.xlu1 %1757, %v1819_v24  }
 0x7b0   :  { %v914_v25 = vpop.permute.xlu0 %913 }
 0x7b1   :  { %v935_v27 = vmul.f32 %v929_v16, %v914_v25 }
 0x7b3   :  { %v939_v28 = vsub.f32 %v877_v63, %v935_v27 }
 0x7b4   :  { %v924_v29 = vpop.permute.xlu1 %923 }
 0x7b5   :  { %v937_v30 = vmul.f32 %v933_v19, %v924_v29  ;;  %975 = vperm.xlu1 %1757, %v939_v28   ;;  %v1587_v19 = vsel %vm1083_vm2, 1.0, %v1856_v4 }
 0x7b7   :  { %v941_v31 = vsub.f32 %v879_v7, %v937_v30  ;;  %v1873_v30 = vmov 10  }
 0x7b9   :  { %985 = vperm.xlu0 %1756, %v941_v31   ;;  %1758 = vset.pattern.permute.xlu1 %v1871_v32 }
 0x7bd   :  { %1759 = vset.pattern.permute.xlu0 %v1871_v32 }
 0x7f7   :  { %v949_v34 = vpop.permute.xlu0 %948 }
 0x7f8   :  { %v956_v35 = vmul.f32 %v949_v34, %v2101_v18 }
 0x7fa   :  { %v991_v45 = vrot.slane %v956_v35, %v2112_v33 }
 0x7fb   :  { %v954_v41 = vpop.permute.xlu1 %953 }
 0x7fc   :  { %v957_v42 = vmul.f32 %v954_v41, %v2105_v22 }
 0x7fe   :  { %v995_v49 = vrot.slane %v957_v42, %v2112_v33 }
 0x834   :  { %v976_v46 = vpop.permute.xlu1 %975 }
 0x835   :  { %v997_v47 = vmul.f32 %v991_v45, %v976_v46 }
 0x837   :  { %v1001_v48 = vsub.f32 %v939_v28, %v997_v47 }
 0x838   :  { %v986_v50 = vpop.permute.xlu0 %985 }
 0x839   :  { %1820 = vrcp.f32 %v1001_v48  ;;  %v999_v51 = vmul.f32 %v995_v49, %v986_v50  ;;  %v1027_v56 = vsub.f32 %v1001_v48, %v1586_v54  ;;  %v1588_v50 = vsel %vm1145_vm3, 1.0, %v1856_v4 }
 0x83b   :  { %v1003_v52 = vsub.f32 %v941_v31, %v999_v51 }
 0x83d   :  { %1822 = vrcp.f32 %v1003_v52  ;;  %v1029_v59 = vsub.f32 %v1003_v52, %v1586_v54 }
 0x843   :  { %v1821_v53 = vpop.eup %1820 }
 0x844   :  { %1010 = vperm.xlu1 %1758, %v1821_v53  }
 0x847   :  { %v1823_v57 = vpop.eup %1822 }
 0x848   :  { %1015 = vperm.xlu0 %1759, %v1823_v57   ;;  %1037 = vperm.xlu1 %1758, %v1027_v56  }
 0x84c   :  { %1760 = vset.pattern.permute.xlu0 %v1870_v8  ;;  %1047 = vperm.xlu1 %1758, %v1029_v59  }
 0x84d   :  { %970 = vperm.xlu0 %1760, %v964_v60  }
 0x850   :  { %1761 = vset.pattern.permute.xlu1 %v1870_v8 }
 0x851   :  { %980 = vperm.xlu1 %1761, %v966_v61   ;;  %1763 = vset.pattern.permute.xlu0 %v1872_v62 }
 0x855   :  { %1762 = vset.pattern.permute.xlu1 %v1872_v62 }
 0x8c3   :  { %v1011_v44 = vpop.permute.xlu1 %1010 }
 0x8c4   :  { %v1018_v63 = vmul.f32 %v1011_v44, %v1001_v48 }
 0x8c6   :  { %v1053_v3 = vrot.slane %v1018_v63, %v1972_v55 }
 0x8c7   :  { %v1016_v6 = vpop.permute.xlu0 %1015  ;;  %v1038_v7 = vpop.permute.xlu1 %1037 }
 0x8c8   :  { %v1019_v11 = vmul.f32 %v1016_v6, %v1003_v52  ;;  %v1059_v12 = vmul.f32 %v1053_v3, %v1038_v7 }
 0x8ca   :  { %v1063_v14 = vsub.f32 %v1001_v48, %v1059_v12  ;;  %v1057_v15 = vrot.slane %v1019_v11, %v1972_v55 }
 0x8cb   :  { %v1048_v16 = vpop.permute.xlu1 %1047 }
 0x8cc   :  { %1824 = vrcp.f32 %v1063_v14  ;;  %v1061_v8 = vmul.f32 %v1057_v15, %v1048_v16  ;;  %v971_v20 = vpop.permute.xlu0 %970  ;;  %v1089_v21 = vsub.f32 %v1063_v14, %v1587_v19 }
 0x8cd   :  { %v996_v24 = vmul.f32 %v991_v45, %v971_v20 }
 0x8ce   :  { %v1065_v13 = vsub.f32 %v1003_v52, %v1061_v8 }
 0x8cf   :  { %v1000_v55 = vsub.f32 %v2101_v18, %v996_v24 }
 0x8d0   :  { %1826 = vrcp.f32 %v1065_v13  ;;  %v981_v25 = vpop.permute.xlu1 %980  ;;  %v1091_v27 = vsub.f32 %v1065_v13, %v1587_v19 }
 0x8d1   :  { %v998_v28 = vmul.f32 %v995_v49, %v981_v25 }
 0x8d3   :  { %v1002_v29 = vsub.f32 %v2105_v22, %v998_v28 }
 0x8d6   :  { %v1825_v17 = vpop.eup %1824 }
 0x8d7   :  { %1072 = vperm.xlu1 %1762, %v1825_v17  }
 0x8da   :  { %v1827_v23 = vpop.eup %1826 }
 0x8db   :  { %1099 = vperm.xlu1 %1762, %v1089_v21   ;;  %1077 = vperm.xlu0 %1763, %v1827_v23   ;;  %v1874_v21 = vmov 11   ;;  %v1589_v23 = vsel %vm1207_vm5, 1.0, %v1856_v4 }
 0x8df   :  { %1109 = vperm.xlu1 %1762, %v1091_v27   ;;  %1764 = vset.pattern.permute.xlu0 %v1871_v32 }
 0x8e0   :  { %1032 = vperm.xlu0 %1764, %v1000_v55  }
 0x8e3   :  { %1765 = vset.pattern.permute.xlu1 %v1871_v32 }
 0x8e4   :  { %1042 = vperm.xlu1 %1765, %v1002_v29   ;;  %1767 = vset.pattern.permute.xlu0 %v1873_v30 }
 0x8e8   :  { %1766 = vset.pattern.permute.xlu1 %v1873_v30 }
 0x956   :  { %v1073_v31 = vpop.permute.xlu1 %1072 }
 0x957   :  { %v1080_v34 = vmul.f32 %v1073_v31, %v1063_v14 }
 0x959   :  { %v1115_v35 = vrot.slane %v1080_v34, %v2059_v36 }
 0x95a   :  { %v1078_v41 = vpop.permute.xlu0 %1077  ;;  %v1100_v42 = vpop.permute.xlu1 %1099 }
 0x95b   :  { %v1081_v18 = vmul.f32 %v1078_v41, %v1065_v13  ;;  %v1121_v45 = vmul.f32 %v1115_v35, %v1100_v42 }
 0x95d   :  { %v1125_v46 = vsub.f32 %v1063_v14, %v1121_v45  ;;  %v1119_v47 = vrot.slane %v1081_v18, %v2059_v36  ;;  %v1875_v45 = vmov 12  }
 0x95e   :  { %v1110_v48 = vpop.permute.xlu1 %1109 }
 0x95f   :  { %1828 = vrcp.f32 %v1125_v46  ;;  %v1123_v22 = vmul.f32 %v1119_v47, %v1110_v48  ;;  %v1033_v51 = vpop.permute.xlu0 %1032  ;;  %v1151_v52 = vsub.f32 %v1125_v46, %v1588_v50 }
 0x960   :  { %v1058_v54 = vmul.f32 %v1053_v3, %v1033_v51 }
 0x961   :  { %v1127_v49 = vsub.f32 %v1065_v13, %v1123_v22 }
 0x962   :  { %v1062_v36 = vsub.f32 %v1000_v55, %v1058_v54 }
 0x963   :  { %1830 = vrcp.f32 %v1127_v49  ;;  %v1043_v56 = vpop.permute.xlu1 %1042  ;;  %v1153_v57 = vsub.f32 %v1127_v49, %v1588_v50 }
 0x964   :  { %v1060_v58 = vmul.f32 %v1057_v15, %v1043_v56 }
 0x966   :  { %v1064_v59 = vsub.f32 %v1002_v29, %v1060_v58 }
 0x969   :  { %v1829_v32 = vpop.eup %1828 }
 0x96a   :  { %1134 = vperm.xlu1 %1766, %v1829_v32  }
 0x96d   :  { %v1831_v53 = vpop.eup %1830 }
 0x96e   :  { %1161 = vperm.xlu1 %1766, %v1151_v52   ;;  %1139 = vperm.xlu0 %1767, %v1831_v53   ;;  %v1590_v53 = vsel %vm1269_vm6, 1.0, %v1856_v4 }
 0x972   :  { %1171 = vperm.xlu1 %1766, %v1153_v57   ;;  %1768 = vset.pattern.permute.xlu0 %v1872_v62 }
 0x973   :  { %1094 = vperm.xlu0 %1768, %v1062_v36  }
 0x976   :  { %1769 = vset.pattern.permute.xlu1 %v1872_v62 }
 0x977   :  { %1104 = vperm.xlu1 %1769, %v1064_v59   ;;  %1771 = vset.pattern.permute.xlu0 %v1873_v30 }
 0x97b   :  { %1770 = vset.pattern.permute.xlu1 %v1873_v30 }
 0x9e9   :  { %v1135_v60 = vpop.permute.xlu1 %1134 }
 0x9ea   :  { %v1142_v61 = vmul.f32 %v1135_v60, %v1125_v46 }
 0x9ec   :  { %v1177_v44 = vrot.slane %v1142_v61, %v2068_v5 }
 0x9ed   :  { %v1140_v63 = vpop.permute.xlu0 %1139  ;;  %v1162_v3 = vpop.permute.xlu1 %1161 }
 0x9ee   :  { %v1143_v6 = vmul.f32 %v1140_v63, %v1127_v49  ;;  %v1183_v7 = vmul.f32 %v1177_v44, %v1162_v3 }
 0x9f0   :  { %v1187_v11 = vsub.f32 %v1125_v46, %v1183_v7  ;;  %v1181_v12 = vrot.slane %v1143_v6, %v2068_v5 }
 0x9f1   :  { %v1172_v14 = vpop.permute.xlu1 %1171 }
 0x9f2   :  { %1832 = vrcp.f32 %v1187_v11  ;;  %v1185_v15 = vmul.f32 %v1181_v12, %v1172_v14  ;;  %v1095_v16 = vpop.permute.xlu0 %1094  ;;  %v1213_v24 = vsub.f32 %v1187_v11, %v1589_v23 }
 0x9f3   :  { %v1120_v8 = vmul.f32 %v1115_v35, %v1095_v16 }
 0x9f4   :  { %v1189_v62 = vsub.f32 %v1127_v49, %v1185_v15 }
 0x9f5   :  { %v1124_v13 = vsub.f32 %v1062_v36, %v1120_v8 }
 0x9f6   :  { %1834 = vrcp.f32 %v1189_v62  ;;  %v1105_v17 = vpop.permute.xlu1 %1104  ;;  %v1215_v27 = vsub.f32 %v1189_v62, %v1589_v23 }
 0x9f7   :  { %v1122_v19 = vmul.f32 %v1119_v47, %v1105_v17  ;;  %1156 = vperm.xlu1 %1770, %v1124_v13  }
 0x9f9   :  { %v1126_v20 = vsub.f32 %v1064_v59, %v1122_v19  ;;  %v1591_v19 = vsel %vm1331_vm7, 1.0, %v1856_v4 }
 0x9fb   :  { %1166 = vperm.xlu0 %1771, %v1126_v20   ;;  %1773 = vset.pattern.permute.xlu1 %v1874_v21 }
 0x9fc   :  { %v1833_v5 = vpop.eup %1832 }
 0x9fd   :  { %1196 = vperm.xlu1 %1773, %v1833_v5  }
 0x9ff   :  { %1772 = vset.pattern.permute.xlu0 %v1874_v21 }
 0xa00   :  { %v1835_v25 = vpop.eup %1834  ;;  %1223 = vperm.xlu0 %1772, %v1213_v24  }
 0xa01   :  { %1201 = vperm.xlu1 %1773, %v1835_v25  }
 0xa05   :  { %1233 = vperm.xlu1 %1773, %v1215_v27  }
 0xa76   :  { %v1157_v55 = vpop.permute.xlu1 %1156 }
 0xa77   :  { %v1182_v28 = vmul.f32 %v1177_v44, %v1157_v55  ;;  %v1876_v44 = vmov 13  }
 0xa79   :  { %v1186_v29 = vsub.f32 %v1124_v13, %v1182_v28  ;;  %v1877_v28 = vmov 14  }
 0xa7a   :  { %v1167_v30 = vpop.permute.xlu0 %1166 }
 0xa7b   :  { %v1184_v31 = vmul.f32 %v1181_v12, %v1167_v30  ;;  %1218 = vperm.xlu1 %1773, %v1186_v29  }
 0xa7c   :  { %v1197_v34 = vpop.permute.xlu1 %1196 }
 0xa7d   :  { %v1188_v35 = vsub.f32 %v1126_v20, %v1184_v31  ;;  %v1204_v41 = vmul.f32 %v1197_v34, %v1187_v11 }
 0xa7f   :  { %1228 = vperm.xlu0 %1772, %v1188_v35   ;;  %v1224_v42 = vpop.permute.xlu0 %1223  ;;  %v1239_v18 = vrot.slane %v1204_v41, %v2075_v40  ;;  %1774 = vset.pattern.permute.xlu1 %v1875_v45 }
 0xa80   :  { %v1202_v46 = vpop.permute.xlu1 %1201 }
 0xa81   :  { %v1245_v47 = vmul.f32 %v1239_v18, %v1224_v42  ;;  %v1205_v48 = vmul.f32 %v1202_v46, %v1189_v62 }
 0xa83   :  { %v1249_v22 = vsub.f32 %v1187_v11, %v1245_v47  ;;  %v1243_v49 = vrot.slane %v1205_v48, %v2075_v40  ;;  %1775 = vset.pattern.permute.xlu0 %v1875_v45 }
 0xa84   :  { %v1234_v32 = vpop.permute.xlu1 %1233 }
 0xa85   :  { %1836 = vrcp.f32 %v1249_v22  ;;  %v1247_v50 = vmul.f32 %v1243_v49, %v1234_v32  ;;  %v1275_v54 = vsub.f32 %v1249_v22, %v1590_v53  ;;  %v1592_v32 = vsel %vm1393_vm8, 1.0, %v1856_v4 }
 0xa87   :  { %v1251_v51 = vsub.f32 %v1189_v62, %v1247_v50 }
 0xa89   :  { %1838 = vrcp.f32 %v1251_v51  ;;  %v1277_v57 = vsub.f32 %v1251_v51, %v1590_v53 }
 0xa8f   :  { %v1837_v52 = vpop.eup %1836 }
 0xa90   :  { %1258 = vperm.xlu1 %1774, %v1837_v52  }
 0xa93   :  { %v1839_v56 = vpop.eup %1838 }
 0xa94   :  { %1285 = vperm.xlu1 %1774, %v1275_v54   ;;  %1263 = vperm.xlu0 %1775, %v1839_v56  }
 0xa98   :  { %1295 = vperm.xlu1 %1774, %v1277_v57  }
 0xafa   :  { %v1219_v36 = vpop.permute.xlu1 %1218 }
 0xafb   :  { %v1244_v40 = vmul.f32 %v1239_v18, %v1219_v36  ;;  %v1878_v36 = vmov 15  }
 0xafd   :  { %v1248_v58 = vsub.f32 %v1186_v29, %v1244_v40 }
 0xafe   :  { %v1229_v59 = vpop.permute.xlu0 %1228 }
 0xaff   :  { %v1246_v60 = vmul.f32 %v1243_v49, %v1229_v59  ;;  %1280 = vperm.xlu0 %1775, %v1248_v58  }
 0xb01   :  { %v1250_v61 = vsub.f32 %v1188_v35, %v1246_v60 }
 0xb03   :  { %1290 = vperm.xlu1 %1774, %v1250_v61   ;;  %1776 = vset.pattern.permute.xlu0 %v1876_v44 }
 0xb07   :  { %1777 = vset.pattern.permute.xlu1 %v1876_v44 }
 0xb0f   :  { %v1259_v63 = vpop.permute.xlu1 %1258 }
 0xb10   :  { %v1266_v3 = vmul.f32 %v1259_v63, %v1249_v22  ;;  %v1593_v63 = vsel %vm1455_vm9, 1.0, %v1856_v4 }
 0xb12   :  { %v1301_v6 = vrot.slane %v1266_v3, %v2082_v10 }
 0xb13   :  { %v1264_v7 = vpop.permute.xlu0 %1263  ;;  %v1286_v11 = vpop.permute.xlu1 %1285 }
 0xb14   :  { %v1267_v12 = vmul.f32 %v1264_v7, %v1251_v51  ;;  %v1307_v14 = vmul.f32 %v1301_v6, %v1286_v11 }
 0xb16   :  { %v1311_v15 = vsub.f32 %v1249_v22, %v1307_v14  ;;  %v1305_v16 = vrot.slane %v1267_v12, %v2082_v10 }
 0xb17   :  { %v1296_v8 = vpop.permute.xlu1 %1295 }
 0xb18   :  { %1840 = vrcp.f32 %v1311_v15  ;;  %v1309_v62 = vmul.f32 %v1305_v16, %v1296_v8  ;;  %v1337_v23 = vsub.f32 %v1311_v15, %v1591_v19 }
 0xb1a   :  { %v1313_v13 = vsub.f32 %v1251_v51, %v1309_v62 }
 0xb1c   :  { %1842 = vrcp.f32 %v1313_v13  ;;  %v1339_v20 = vsub.f32 %v1313_v13, %v1591_v19 }
 0xb22   :  { %v1841_v17 = vpop.eup %1840 }
 0xb23   :  { %1320 = vperm.xlu0 %1776, %v1841_v17  }
 0xb26   :  { %v1843_v21 = vpop.eup %1842 }
 0xb27   :  { %1357 = vperm.xlu0 %1776, %v1339_v20   ;;  %1325 = vperm.xlu1 %1777, %v1843_v21  }
 0xb2b   :  { %1347 = vperm.xlu1 %1777, %v1337_v23  }
 0xb7e   :  { %v1281_v5 = vpop.permute.xlu0 %1280 }
 0xb7f   :  { %v1306_v24 = vmul.f32 %v1301_v6, %v1281_v5 }
 0xb81   :  { %v1310_v10 = vsub.f32 %v1248_v58, %v1306_v24 }
 0xb82   :  { %v1291_v25 = vpop.permute.xlu1 %1290 }
 0xb83   :  { %v1308_v27 = vmul.f32 %v1305_v16, %v1291_v25  ;;  %1342 = vperm.xlu1 %1777, %v1310_v10  }
 0xb85   :  { %v1312_v55 = vsub.f32 %v1250_v61, %v1308_v27 }
 0xb87   :  { %1352 = vperm.xlu0 %1776, %v1312_v55   ;;  %1778 = vset.pattern.permute.xlu1 %v1877_v28 }
 0xb8b   :  { %1779 = vset.pattern.permute.xlu0 %v1877_v28 }
 0xba2   :  { %v1321_v29 = vpop.permute.xlu0 %1320 }
 0xba3   :  { %v1328_v30 = vmul.f32 %v1321_v29, %v1311_v15 }
 0xba5   :  { %v1363_v41 = vrot.slane %v1328_v30, %v2089_v43 }
 0xba6   :  { %v1326_v31 = vpop.permute.xlu1 %1325  ;;  %v1358_v42 = vpop.permute.xlu0 %1357 }
 0xba7   :  { %v1329_v34 = vmul.f32 %v1326_v31, %v1313_v13 }
 0xba9   :  { %v1367_v35 = vrot.slane %v1329_v34, %v2089_v43 }
 0xbaa   :  { %v1348_v18 = vpop.permute.xlu1 %1347 }
 0xbab   :  { %v1371_v45 = vmul.f32 %v1367_v35, %v1358_v42  ;;  %v1369_v46 = vmul.f32 %v1363_v41, %v1348_v18 }
 0xbad   :  { %v1375_v47 = vsub.f32 %v1313_v13, %v1371_v45  ;;  %v1373_v48 = vsub.f32 %v1311_v15, %v1369_v46 }
 0xbaf   :  { %1844 = vrcp.f32 %v1375_v47  ;;  %v1399_v50 = vsub.f32 %v1373_v48, %v1592_v32  ;;  %v1401_v51 = vsub.f32 %v1375_v47, %v1592_v32 }
 0xbb0   :  { %1846 = vrcp.f32 %v1373_v48 }
 0xbb9   :  { %v1845_v22 = vpop.eup %1844 }
 0xbba   :  { %v1847_v49 = vpop.eup %1846  ;;  %1387 = vperm.xlu0 %1779, %v1845_v22  }
 0xbbb   :  { %1382 = vperm.xlu1 %1778, %v1847_v49  }
 0xbbf   :  { %1409 = vperm.xlu1 %1778, %v1399_v50  }
 0xbc3   :  { %1419 = vperm.xlu1 %1778, %v1401_v51  }
 0xc02   :  { %v1343_v43 = vpop.permute.xlu1 %1342 }
 0xc03   :  { %v1368_v52 = vmul.f32 %v1363_v41, %v1343_v43 }
 0xc05   :  { %v1372_v53 = vsub.f32 %v1310_v10, %v1368_v52 }
 0xc06   :  { %v1353_v54 = vpop.permute.xlu0 %1352 }
 0xc07   :  { %v1370_v56 = vmul.f32 %v1367_v35, %v1353_v54  ;;  %1404 = vperm.xlu0 %1779, %v1372_v53  }
 0xc09   :  { %v1374_v57 = vsub.f32 %v1312_v55, %v1370_v56 }
 0xc0b   :  { %1414 = vperm.xlu1 %1778, %v1374_v57   ;;  %1781 = vset.pattern.permute.xlu0 %v1878_v36 }
 0xc0f   :  { %1780 = vset.pattern.permute.xlu1 %v1878_v36 }
 0xc39   :  { %v1388_v61 = vpop.permute.xlu0 %1387 }
 0xc3a   :  { %v1383_v40 = vpop.permute.xlu1 %1382  ;;  %v1391_v6 = vmul.f32 %v1388_v61, %v1375_v47 }
 0xc3b   :  { %v1390_v58 = vmul.f32 %v1383_v40, %v1373_v48 }
 0xc3c   :  { %v1429_v12 = vrot.slane %v1391_v6, %v2098_v9 }
 0xc3d   :  { %v1425_v59 = vrot.slane %v1390_v58, %v2098_v9 }
 0xc3e   :  { %v1410_v60 = vpop.permute.xlu1 %1409 }
 0xc3f   :  { %v1431_v44 = vmul.f32 %v1425_v59, %v1410_v60 }
 0xc41   :  { %v1435_v3 = vsub.f32 %v1373_v48, %v1431_v44 }
 0xc42   :  { %v1420_v11 = vpop.permute.xlu1 %1419 }
 0xc43   :  { %1848 = vrcp.f32 %v1435_v3  ;;  %v1461_v7 = vsub.f32 %v1435_v3, %v1593_v63  ;;  %v1433_v14 = vmul.f32 %v1429_v12, %v1420_v11 }
 0xc45   :  { %1471 = vperm.xlu0 %1781, %v1461_v7   ;;  %v1437_v15 = vsub.f32 %v1375_v47, %v1433_v14 }
 0xc47   :  { %v1463_v8 = vsub.f32 %v1437_v15, %v1593_v63  ;;  %1850 = vrcp.f32 %v1437_v15 }
 0xc48   :  { %1852 = vtanh.f32 %v1984_v0 }
 0xc4d   :  { %v1849_v16 = vpop.eup %1848 }
 0xc4e   :  { %1444 = vperm.xlu0 %1781, %v1849_v16  }
 0xc51   :  { %v1851_v20 = vpop.eup %1850 }
 0xc52   :  { %1481 = vperm.xlu0 %1781, %v1463_v8   ;;  %v1853_v27 = vpop.eup %1852 }
 0xc56   :  { %1783 = vset.pattern.permute.xlu0 %v1879_v26 }
 0xc86   :  { %v1405_v62 = vpop.permute.xlu0 %1404 }
 0xc87   :  { %v1430_v13 = vmul.f32 %v1425_v59, %v1405_v62 }
 0xc89   :  { %v1434_v4 = vsub.f32 %v1372_v53, %v1430_v13 }
 0xc8a   :  { %v1415_v17 = vpop.permute.xlu1 %1414 }
 0xc8b   :  { %1466 = vperm.xlu1 %1780, %v1434_v4   ;;  %v1432_v19 = vmul.f32 %v1429_v12, %v1415_v17 }
 0xc8d   :  { %v1436_v21 = vsub.f32 %v1374_v57, %v1432_v19 }
 0xc8f   :  { %1449 = vperm.xlu1 %1780, %v1851_v20  }
 0xc93   :  { %1476 = vperm.xlu1 %1780, %v1436_v21  }
 0xc97   :  { %1782 = vset.pattern.permute.xlu1 %v1879_v26 }
 0xcc4   :  { %v1472_v9 = vpop.permute.xlu0 %1471 }
 0xccd   :  { %v1445_v23 = vpop.permute.xlu0 %1444 }
 0xcce   :  { %v1452_v5 = vmul.f32 %v1445_v23, %v1435_v3 }
 0xcd0   :  { %v1487_v24 = vrot.slane %v1452_v5, %v2112_v33 }
 0xcd1   :  { %v1482_v42 = vpop.permute.xlu0 %1481 }
 0xcd2   :  { %v1493_v10 = vmul.f32 %v1487_v24, %v1472_v9 }
 0xcd4   :  { %v1497_v25 = vsub.f32 %v1435_v3, %v1493_v10 }
 0xcd6   :  { %1507 = vperm.xlu0 %1783, %v1497_v25  }
 0xcda   :  { %129 = vrot.lane.b32.xlu0 %v1853_v27, %s1857_s0 }
 0xd0a   :  { %v1467_v55 = vpop.permute.xlu1 %1466 }
 0xd0b   :  { %v1492_v28 = vmul.f32 %v1487_v24, %v1467_v55 }
 0xd0d   :  { %v1496_v29 = vsub.f32 %v1434_v4, %v1492_v28 }
 0xd0e   :  { %v1450_v30 = vpop.permute.xlu1 %1449 }
 0xd0f   :  { %v1453_v31 = vmul.f32 %v1450_v30, %v1437_v15  ;;  %1502 = vperm.xlu1 %1782, %v1496_v29  }
 0xd11   :  { %v1491_v34 = vrot.slane %v1453_v31, %v2112_v33 }
 0xd12   :  { %v1477_v35 = vpop.permute.xlu1 %1476 }
 0xd13   :  { %v1494_v41 = vmul.f32 %v1491_v34, %v1477_v35  ;;  %v1495_v18 = vmul.f32 %v1491_v34, %v1482_v42 }
 0xd15   :  { %v1498_v45 = vsub.f32 %v1436_v21, %v1494_v41  ;;  %v1499_v46 = vsub.f32 %v1437_v15, %v1495_v18 }
 0xd17   :  { %1512 = vperm.xlu1 %1782, %v1498_v45  }
 0xd1b   :  { %1517 = vperm.xlu1 %1782, %v1499_v46  }
 0xd55   :  { %v1508_v47 = vpop.permute.xlu0 %1507 }
 0xd56   :  { %v1521_v49 = vmul.f32 %v1508_v47, %v1996_v38 }
 0xd58   :  { %v1525_v33 = vsel %vm322_vm4, %v1521_v49, 0.0 }
 0xd59   :  { %v130_v48 = vpop.permute.xlu0 %129 }
 0xd5a   :  { %v132_v22 = vmul.f32 %v130_v48, %v1957_v37 }
 0xd5c   :  { %1553 = vrot.lane.b32.xlu0 %v132_v22, %s1860_s15 }
 0xd8e   :  { %v1503_v32 = vpop.permute.xlu1 %1502 }
 0xd8f   :  { %v1520_v50 = vmul.f32 %v1503_v32, %v1998_v39 }
 0xd91   :  { %v1524_v51 = vsel %vm322_vm4, %v1520_v50, 0.0 }
 0xd92   :  { %v1526_v43 = vadd.f32 %v1525_v33, %v1524_v51 }
 0xd94   :  { %v1527_v52 = vrot.slane %v1526_v43, 4 }
 0xd96   :  { %v1513_v53 = vpop.permute.xlu1 %1512  ;;  %v1528_v54 = vadd.f32 %v1527_v52, %v1526_v43 }
 0xd97   :  { %v1522_v56 = vmul.f32 %v1513_v53, %v2014_v1 }
 0xd98   :  { %v1529_v36 = vrot.slane %v1528_v54, 2 }
 0xd99   :  { %v1533_v40 = vsel %vm322_vm4, %v1522_v56, 0.0 }
 0xd9a   :  { %v1518_v57 = vpop.permute.xlu1 %1517  ;;  %v1530_v39 = vadd.f32 %v1529_v36, %v1528_v54 }
 0xd9b   :  { %v1523_v37 = vmul.f32 %v1518_v57, %v2012_v2 }
 0xd9c   :  { %v1531_v61 = vrot.slane %v1530_v39, 1 }
 0xd9d   :  { %v1534_v38 = vsel %vm322_vm4, %v1523_v37, 0.0 }
 0xd9e   :  { %v1535_v58 = vadd.f32 %v1534_v38, %v1533_v40  ;;  %v1532_v6 = vadd.f32 %v1531_v61, %v1530_v39 }
 0xda0   :  { %v1536_v59 = vrot.slane %v1535_v58, 4  ;;  %v1542_v1 = vmul.f32 0.5, %v1532_v6 }
 0xda2   :  { %v1537_v60 = vadd.f32 %v1536_v59, %v1535_v58 }
 0xda4   :  { %v1538_v44 = vrot.slane %v1537_v60, 2 }
 0xda6   :  { %v1539_v63 = vadd.f32 %v1538_v44, %v1537_v60 }
 0xda8   :  { %v1540_v3 = vrot.slane %v1539_v63, 1 }
 0xdaa   :  { %v1541_v7 = vadd.f32 %v1540_v3, %v1539_v63 }
 0xdac   :  { %v1543_v11 = vmul.f32 0.5, %v1541_v7 }
 0xdae   :  { %v1547_v12 = vsel %vm1546_vm10, %v1543_v11, %v1542_v1 }
 0xdaf   :  { %1548 = vrot.lane.b32.xlu1 %v1547_v12, %s1860_s15 }
 0xdce   :  { %v1554_v15 = vpop.permute.xlu0 %1553 }
 0xe21   :  { %v1549_v2 = vpop.permute.xlu1 %1548 }
 0xe22   :  { %v1551_v14 = vsub.f32 %v1984_v0, %v1549_v2 }
 0xe24   :  { %v1556_v16 = vsel %vm322_vm4, %v1554_v15, %v1551_v14 }
 0xe25   :  { %v1558_v8 = vsel %vm1557_vm11, %v1556_v16, 0.0 }
 0xe26   :  { %1559 = vst [vmem:[%s2183_s2] sm:$0x3] %v1558_v8 }

</bundles_post_ra>
